<compile_context>
chip_gen: v7x
topology: tpu7x:2x2x1
jax: 0.10.0
libtpu: 0.0.40
codegen_flags: <defaults>
</compile_context>

<pallas_src>
import math

import numpy as np
import jax
import jax.numpy as jnp
from jax.experimental import pallas as pl
from jax.experimental.pallas import tpu as pltpu

TILE_N = 4096    # conv point-tile (lane axis inside the kernel; multiple of 128)
BN_TILE = 8192   # bn+relu point-tile; points are padded to a multiple of this (also of TILE_N)


# ---------------------------------------------------------------------------
# Pallas kernels
# ---------------------------------------------------------------------------
def _deconv_stats_kernel(w_ref, g_ref, o_ref, sum_ref, sq_ref):
    """Fused sparse transposed-conv GEMM + per-channel partial sum / sum-of-squares.

    w_ref   : [Cout, KCp]      bf16  (full weight, VMEM-resident, same block every step)
    g_ref   : [KCp, TILE_N]    bf16  (gathered neighbor features, channels-first)
    o_ref   : [Cout, TILE_N]   bf16  (lane-dense conv output tile)
    sum_ref : [1, Cout, 1]     f32   per-tile partial sum   (reduced in the wrapper)
    sq_ref  : [1, Cout, 1]     f32   per-tile partial sum of squares
    All outputs are per-tile -> grid axis is fully "parallel" (megacore-shardable on v7x).
    """
    y = jnp.dot(w_ref[...], g_ref[...], preferred_element_type=jnp.float32)
    o_ref[...] = y.astype(o_ref.dtype)                       # bf16 store (halves conv write)
    # BN statistics from the f32 accumulator (before the bf16 cast); padded columns are exact
    # zeros and contribute nothing.  VPU mul + XLU lane reductions ride in otherwise-idle slots.
    sum_ref[...] = jnp.sum(y, axis=-1, keepdims=True)[None]
    sq_ref[...] = jnp.sum(y * y, axis=-1, keepdims=True)[None]


def _bn_relu_kernel(x_ref, scale_ref, shift_ref, o_ref):
    """BatchNorm affine (precomputed per-channel scale/shift) + ReLU, channels-first, bf16 in."""
    y = x_ref[...].astype(jnp.float32) * scale_ref[...] + shift_ref[...]
    o_ref[...] = jnp.maximum(y, 0.0)


# ---------------------------------------------------------------------------
# Pallas wrappers
# ---------------------------------------------------------------------------
def deconv_stats(gathered_t, w_lhs):
    # gathered_t: [KCp, Np] bf16, w_lhs: [Cout, KCp] bf16
    KCp, Np = gathered_t.shape
    Cout = w_lhs.shape[0]
    n_tiles = Np // TILE_N
    return pl.pallas_call(
        _deconv_stats_kernel,
        out_shape=(jax.ShapeDtypeStruct((Cout, Np), jnp.bfloat16),
                   jax.ShapeDtypeStruct((n_tiles, Cout, 1), jnp.float32),
                   jax.ShapeDtypeStruct((n_tiles, Cout, 1), jnp.float32)),
        grid=(n_tiles,),
        in_specs=[pl.BlockSpec((Cout, KCp), lambda i: (0, 0)),     # weights: resident
                  pl.BlockSpec((KCp, TILE_N), lambda i: (0, i))],  # gathered slab tile
        out_specs=(pl.BlockSpec((Cout, TILE_N), lambda i: (0, i)),
                   pl.BlockSpec((1, Cout, 1), lambda i: (i, 0, 0)),
                   pl.BlockSpec((1, Cout, 1), lambda i: (i, 0, 0))),
        # every output block is per-tile -> no residency, safe to shard across TCs (v7x)
        compiler_params=pltpu.CompilerParams(dimension_semantics=("parallel",)),
    )(w_lhs, gathered_t)


def bn_relu(conv_t, scale, shift):
    # conv_t: [Cout, Np] bf16; scale/shift: [Cout, 1] f32
    Cout, Np = conv_t.shape
    n_tiles = Np // BN_TILE
    return pl.pallas_call(
        _bn_relu_kernel,
        out_shape=jax.ShapeDtypeStruct((Cout, Np), jnp.float32),
        grid=(n_tiles,),
        in_specs=[pl.BlockSpec((Cout, BN_TILE), lambda i: (0, i)),
                  pl.BlockSpec((Cout, 1), lambda i: (0, 0)),
                  pl.BlockSpec((Cout, 1), lambda i: (0, 0))],
        out_specs=pl.BlockSpec((Cout, BN_TILE), lambda i: (0, i)),
        compiler_params=pltpu.CompilerParams(dimension_semantics=("parallel",)),
    )(conv_t, scale, shift)


# ---------------------------------------------------------------------------
# Glue: transposed-conv kernel map + channels-first bf16 gather
# ---------------------------------------------------------------------------
def build_transposed_kernel_map(coords_np, spatial, ks=3, dilation=1):
    """Kernel map for stride=1 TRANSPOSED conv: output coords == input coords; for weight
    slice k the contributing input sits at coord - offset[k] (adjoint spatial pattern).
    Returns [K, N] neighbor indices; MISSING neighbors are encoded as index N (the appended
    zero column of the feature gather source).  Built once per coordinate set (hoisted out of
    the forward path)."""
    coords_np = np.asarray(coords_np)
    N = coords_np.shape[0]
    B = int(coords_np[:, 0].max()) + 1
    dense = -np.ones((B, spatial, spatial, spatial), dtype=np.int64)
    dense[coords_np[:, 0], coords_np[:, 1], coords_np[:, 2], coords_np[:, 3]] = np.arange(N)

    r = ks // 2
    offsets = [(dx, dy, dz)
               for dx in range(-r, r + 1)
               for dy in range(-r, r + 1)
               for dz in range(-r, r + 1)]
    nbr = np.full((len(offsets), N), N, dtype=np.int32)
    b, x, y, z = coords_np[:, 0], coords_np[:, 1], coords_np[:, 2], coords_np[:, 3]
    for k, (dx, dy, dz) in enumerate(offsets):
        nx, ny, nz = x - dx * dilation, y - dy * dilation, z - dz * dilation  # transposed conv
        valid = ((nx >= 0) & (nx < spatial) & (ny >= 0) & (ny < spatial)
                 & (nz >= 0) & (nz < spatial))
        cx = np.clip(nx, 0, spatial - 1)
        cy = np.clip(ny, 0, spatial - 1)
        cz = np.clip(nz, 0, spatial - 1)
        idx = dense[b, cx, cy, cz]
        nbr[k] = np.where(valid & (idx >= 0), idx, N).astype(np.int32)
    return nbr


def gather_neighbors_cfirst(feats, nbr_idx, kc_pad, np_pad):
    """feats [N, Cin] f32, nbr_idx [K, N] (index N == missing) -> bf16 slab [kc_pad, np_pad]
    in channels-first layout with contraction index c*K + k (matches the flattened weight).
    One bf16 gather: cast before take, missing neighbors hit the appended zero column."""
    K, N = nbr_idx.shape
    Cin = feats.shape[1]
    feats_t = jnp.concatenate(
        [feats.astype(jnp.bfloat16).T, jnp.zeros((Cin, 1), jnp.bfloat16)], axis=1)  # [Cin, N+1]
    g = jnp.take(feats_t, nbr_idx, axis=1)                   # [Cin, K, N] bf16
    g = g.reshape(Cin * K, N)
    return jnp.pad(g, ((0, kc_pad - Cin * K), (0, np_pad - N)))


# ---------------------------------------------------------------------------
# BasicDeconvolutionBlock equivalent
# ---------------------------------------------------------------------------
class BasicDeconvolutionBlockPallas:
    def __init__(self, inc, outc, ks=3, stride=1, dilation=1, key=None):
        assert stride == 1  # TODO(synk): strided transposed-conv upsampling (new output coord set) not implemented
        self.inc, self.outc, self.ks, self.dilation = inc, outc, ks, dilation
        K = ks ** 3
        kc = K * inc
        # bf16 sublane packing only needs a multiple of 16 (108 -> 112, not 128): ~18% fewer
        # bytes on the dominant slab stream.  Weight block is full-array so (8,128) rule holds.
        self.kc_pad = ((kc + 15) // 16) * 16

        # deterministic synthetic init (kaiming-style fan-in scaling, as torchsparse does)
        std = 1.0 / math.sqrt(inc * K)
        self.w = jax.random.normal(key, (K, inc, outc), dtype=jnp.float32) * std
        # flatten kernel offsets into the contraction: row index = c*K + k
        w_flat = jnp.pad(self.w.transpose(1, 0, 2).reshape(kc, outc),
                         ((0, self.kc_pad - kc), (0, 0)))
        self.w_lhs = w_flat.T.astype(jnp.bfloat16)           # [Cout, kc_pad], VMEM-resident

        self.gamma = jnp.ones((outc, 1), dtype=jnp.float32)
        self.beta = jnp.zeros((outc, 1), dtype=jnp.float32)
        self.eps = 1e-5

    def __call__(self, feats, nbr):
        N = feats.shape[0]
        Np = ((N + BN_TILE - 1) // BN_TILE) * BN_TILE        # multiple of BN_TILE and TILE_N
        g = gather_neighbors_cfirst(feats, nbr, self.kc_pad, Np)   # [kc_pad, Np] bf16

        # Fused transposed-conv GEMM + per-tile BN partial statistics (single activation pass).
        conv_t, psum, psq = deconv_stats(g, self.w_lhs)      # bf16 [Cout,Np], f32 [T,Cout,1] x2

        # BatchNorm (training-mode batch statistics, biased variance) + ReLU.
        s = jnp.sum(psum, axis=0)                            # [Cout, 1]
        sq = jnp.sum(psq, axis=0)
        mean = s / N
        # one-pass variance in f32; clamp guards cancellation (TODO(synk): Welford if BN parity
        # at |mean| >> std matters)
        var = jnp.maximum(sq / N - mean * mean, 0.0)
        scale = self.gamma / jnp.sqrt(var + self.eps)
        shift = self.beta - mean * scale
        out_t = bn_relu(conv_t, scale, shift)                # [Cout, Np] f32, lane-dense
        return out_t[:, :N].T                                # back to [N, Cout]


if __name__ == "__main__":
    key = jax.random.PRNGKey(0)
    k_coord, k_feat, k_w = jax.random.split(key, 3)

    B, S = 2, 16           # batches, spatial resolution per axis
    pts_per_batch = 600
    inc, outc = 4, 8

    # deterministic sparse voxel coordinates (unique per batch)
    coord_list = []
    for b in range(B):
        perm = jax.random.permutation(jax.random.fold_in(k_coord, b), S * S * S)[:pts_per_batch]
        x = perm // (S * S)
        y = (perm // S) % S
        z = perm % S
        coord_list.append(jnp.stack([jnp.full_like(x, b), x, y, z], axis=1))
    coords = jnp.concatenate(coord_list, axis=0).astype(jnp.int32)   # [N, 4]
    N = coords.shape[0]
    feats = jax.random.normal(k_feat, (N, inc), dtype=jnp.float32)   # [N, Cin]

    # kernel map built once per coordinate set (hoisted out of the forward path)
    nbr = jnp.asarray(build_transposed_kernel_map(np.asarray(coords), S, ks=3, dilation=1))

    block = BasicDeconvolutionBlockPallas(inc, outc, ks=3, stride=1, key=k_w)
    out = block(feats, nbr)
    jax.block_until_ready(out)
    assert out.shape == (N, outc)

    # f32 parity reference (sparse transposed conv -> training-mode BN -> ReLU); tolerance
    # covers the bf16 MXU feed and one-pass variance.
    feats_ext = jnp.concatenate([feats, jnp.zeros((1, inc), jnp.float32)], axis=0)
    g_ref = feats_ext[nbr]                                   # [K, N, Cin]
    y_ref = jnp.einsum('kni,kio->no', g_ref, block.w)        # [N, Cout]
    mean_r = y_ref.mean(axis=0)
    var_r = y_ref.var(axis=0)                                # biased, training-mode
    y_bn = (y_ref - mean_r) / jnp.sqrt(var_r + block.eps) * block.gamma[:, 0] + block.beta[:, 0]
    ref = jnp.maximum(y_bn, 0.0)
    max_err = float(jnp.max(jnp.abs(out - ref)))
    assert max_err < 5e-2, f"parity check failed: max abs err {max_err}"
    print("KERNEL_OK")
</pallas_src>

<mosaic_0001>
module attributes {stable_mosaic.version = 11 : i64} {
  func.func @_deconv_stats_kernel(%arg0: i32, %arg1: memref<8x112xbf16, #tpu.memory_space<vmem>>, %arg2: memref<112x4096xbf16, #tpu.memory_space<vmem>>, %arg3: memref<8x4096xbf16, #tpu.memory_space<vmem>>, %arg4: memref<1x8x1xf32, #tpu.memory_space<vmem>>, %arg5: memref<1x8x1xf32, #tpu.memory_space<vmem>>) attributes {dimension_semantics = [#tpu.dimension_semantics<parallel>], iteration_bounds = array<i64: 2>, scalar_prefetch = 0 : i64, scratch_operands = 0 : i64, tpu.core_type = #tpu.core_type<tc>, window_params = [{pipeline_mode = #tpu.pipeline_mode<synchronous>, transform_indices = @transform_0, window_bounds = array<i64: 8, 112>}, {transform_indices = @transform_1, window_bounds = array<i64: 112, 4096>}, {transform_indices = @transform_2, window_bounds = array<i64: 8, 4096>}, {transform_indices = @transform_3, window_bounds = array<i64: 1, 8, 1>}, {transform_indices = @transform_4, window_bounds = array<i64: 1, 8, 1>}]} {
    %c0 = arith.constant 0 : index
    %c0_0 = arith.constant 0 : index
    %0 = vector.load %arg1[%c0, %c0_0] : memref<8x112xbf16, #tpu.memory_space<vmem>>, vector<8x112xbf16>
    %c0_1 = arith.constant 0 : index
    %c0_2 = arith.constant 0 : index
    %1 = vector.load %arg2[%c0_1, %c0_2] : memref<112x4096xbf16, #tpu.memory_space<vmem>>, vector<112x4096xbf16>
    %cst = arith.constant dense<0.000000e+00> : vector<8x4096xf32>
    %2 = tpu.matmul %0, %1, %cst {dimension_numbers = #tpu.dot_dimension_numbers<[1], [0], [0], [1], [0, 0, 1, 1], [], []>} : vector<8x112xbf16>, vector<112x4096xbf16>, vector<8x4096xf32> -> vector<8x4096xf32>
    %3 = arith.truncf %2 : vector<8x4096xf32> to vector<8x4096xbf16>
    %c0_3 = arith.constant 0 : index
    %c0_4 = arith.constant 0 : index
    %4 = vector.load %arg3[%c0_3, %c0_4] : memref<8x4096xbf16, #tpu.memory_space<vmem>>, vector<8x4096xbf16>
    tpu.vector_store %arg3[%c0_3, %c0_4], %3 {strides = array<i32>} : memref<8x4096xbf16, #tpu.memory_space<vmem>>, vector<8x4096xbf16>,
    %cst_5 = arith.constant dense<0.000000e+00> : vector<8xf32>
    %5 = vector.multi_reduction <add>, %2, %cst_5 [1] : vector<8x4096xf32> to vector<8xf32>
    %6 = vector.shape_cast %5 : vector<8xf32> to vector<8x1xf32>
    %7 = vector.shape_cast %6 : vector<8x1xf32> to vector<1x8x1xf32>
    %c0_6 = arith.constant 0 : index
    %c0_7 = arith.constant 0 : index
    %c0_8 = arith.constant 0 : index
    %8 = vector.load %arg4[%c0_6, %c0_7, %c0_8] : memref<1x8x1xf32, #tpu.memory_space<vmem>>, vector<1x8x1xf32>
    tpu.vector_store %arg4[%c0_6, %c0_7, %c0_8], %7 {strides = array<i32>} : memref<1x8x1xf32, #tpu.memory_space<vmem>>, vector<1x8x1xf32>,
    %9 = arith.mulf %2, %2 : vector<8x4096xf32>
    %cst_9 = arith.constant dense<0.000000e+00> : vector<8xf32>
    %10 = vector.multi_reduction <add>, %9, %cst_9 [1] : vector<8x4096xf32> to vector<8xf32>
    %11 = vector.shape_cast %10 : vector<8xf32> to vector<8x1xf32>
    %12 = vector.shape_cast %11 : vector<8x1xf32> to vector<1x8x1xf32>
    %c0_10 = arith.constant 0 : index
    %c0_11 = arith.constant 0 : index
    %c0_12 = arith.constant 0 : index
    %13 = vector.load %arg5[%c0_10, %c0_11, %c0_12] : memref<1x8x1xf32, #tpu.memory_space<vmem>>, vector<1x8x1xf32>
    tpu.vector_store %arg5[%c0_10, %c0_11, %c0_12], %12 {strides = array<i32>} : memref<1x8x1xf32, #tpu.memory_space<vmem>>, vector<1x8x1xf32>,
    return
  }
  func.func @transform_0(%arg0: i32) -> (i32, i32) {
    %c0_i32 = arith.constant 0 : i32
    %c0_i32_0 = arith.constant 0 : i32
    %c0_i32_1 = arith.constant 0 : i32
    return %c0_i32, %c0_i32_0 : i32, i32
  }
  func.func @transform_1(%arg0: i32) -> (i32, i32) {
    %c0_i32 = arith.constant 0 : i32
    %c0_i32_0 = arith.constant 0 : i32
    return %c0_i32, %arg0 : i32, i32
  }
  func.func @transform_2(%arg0: i32) -> (i32, i32) {
    %c0_i32 = arith.constant 0 : i32
    %c0_i32_0 = arith.constant 0 : i32
    return %c0_i32, %arg0 : i32, i32
  }
  func.func @transform_3(%arg0: i32) -> (i32, i32, i32) {
    %c0_i32 = arith.constant 0 : i32
    %c0_i32_0 = arith.constant 0 : i32
    %c0_i32_1 = arith.constant 0 : i32
    return %arg0, %c0_i32, %c0_i32_0 : i32, i32, i32
  }
  func.func @transform_4(%arg0: i32) -> (i32, i32, i32) {
    %c0_i32 = arith.constant 0 : i32
    %c0_i32_0 = arith.constant 0 : i32
    %c0_i32_1 = arith.constant 0 : i32
    return %arg0, %c0_i32, %c0_i32_0 : i32, i32, i32
  }
}

</mosaic_0001>

<bundles_post_ra>
// kernel: tpu_custom_call.1
= control target key start
LH: loop header
LB: loop body
LE: loop exit
PB: predicated region body
PF: predicated region fallthrough
CT: control target
= control target key end

     0   :  { %10 = vsyncpa [#allocation3], 0  ;;  %s3674_s0 = inlined_call_operand.hbm [shape: bf16[8,112], index: 0, kind: input, shape index: {}]   ;;  %s3675_s1 = inlined_call_operand.hbm [shape: bf16[112,8192], index: 1, kind: input, shape index: {}]   ;;  %s3676_s2 = inlined_call_operand.hbm [shape: bf16[8,8192], index: 2, kind: output, shape index: {0}]   ;;  %s3677_s3 = inlined_call_operand.vmem [shape: f32[2,8,1], index: 3, kind: output, shape index: {1}]   ;;  %s3678_s4 = inlined_call_operand.vmem [shape: f32[2,8,1], index: 4, kind: output, shape index: {2}]  }
   0x1   :  { %11 = vsyncpa [#allocation6], 0 }
   0x2   :  { %13 = vsyncpa [#allocation6 + $0x1], 0 }
   0x3   :  { %14 = vsyncpa [#allocation4], 0 }
   0x4   :  { %16 = vsyncpa [#allocation4 + $0x1], 0  ;;  %s3178_s15 = smov 0   ;;  %s3180_s16 = smov 0  }
   0x5   :  { %s3182_s17 = smov 0   ;;  %s3184_s18 = smov 0  }
   0x6 LB: > { %s3199_s19 = sadd.s32 4294967295, %s3144_s18   ;;  %s2662_s20 = sadd.s32 4294967294, %s3144_s18   ;;  %s3144_s18 = sphi %s3184_s18, %s3703_s18   ;;  %s3140_s17 = sphi %s3182_s17, %s3702_s17   ;;  %s3136_s16 = sphi %s3180_s16, %s3701_s16   ;;  %s3132_s15 = sphi %s3178_s15, %s3700_s15  }
   0x7   : > { %s3203_s21 = sadd.s32 1, %s3144_s18   ;;  %s50_s22 = sadd.s32 1, %s3140_s17 }
   0x8   : > { %s47_s23 = ssub.s32 %s3144_s18, %s3203_s21  ;;  %p57_p0 = scmp.ne.s32.totalorder %s3140_s17, %s3136_s16 }
   0x9   : > { %p48_p1 = scmp.eq.s32.totalorder %s47_s23, 0  ;;  %p58_p2 = scmp.eq.s32.totalorder %s3144_s18, 0 }
   0xa   : > { %p63_p3 = scmp.ne.s32.totalorder %s3136_s16, %s3132_s15  ;;  %p3679_p4 = scmp.eq.s32.totalorder %s3199_s19, 0 }
   0xb   : > { %s3215_s24 = scalar_select %p48_p1, %s3140_s17, %s50_s22  }
   0xc   : > { %p3217_p5 = por %p58_p2, %p57_p0  ;;  %p3223_p6 = por %p3679_p4, %p63_p3 }
   0xd   : > { %p87_p7 = scmp.eq.s32.totalorder %s3199_s19, 1  ;;  %p93_p8 = scmp.eq.s32.totalorder %s2662_s20, 1 }
   0xe   : > { %s3685_s26 = scalar_select %p3223_p6, 1, 0 }
   0xf   : > { %p2663_p9 = scmp.ge.s32.totalorder %s3144_s18, 1  ;;  %p152_p10 = scmp.lt.s32.totalorder %s3144_s18, 3 }
  0x10   : > { %p3230_p11 = por %p87_p7, %p57_p0  ;;  %p3234_p12 = por %p93_p8, %p63_p3 }
  0x11   : > { %p3238_p13 = pnand %p2663_p9, %p152_p10  ;;  %s3146_s30 = smov [#allocation2]  }
  0x12   : > { %s3686_s27 = scalar_select %p3230_p11, 1, 0 }
  0x13   : > { %s3687_s28 = scalar_select %p3234_p12, 1, 0 }
  0x14   : > { %s3688_s29 = scalar_select %p3238_p13, 1, 0 }
  0x15   : > { %p2962_p2 = pneg %p3238_p13  ;;  %s165_s5 = sshll.u32 %s3146_s30, 4  ;;  %s166_s5 = int_to_ptr.vmem [resolvable:$true] %s165_s5 }
  0x16   : > { %p2975_p4 = scmp.lt.s32.totalorder %s3144_s18, 2  ;;  %p3689_p0 = scmp.eq.s32.totalorder %s3199_s19, 0 }
  0x17   : > { %s176_s7 = sand.u32 1, %s3140_s17   ;;  %s3016_s12 = scalar_lea.hbm %s3674_s0, 64 }
  0x18   : > { %p3248_p7 = pnand %p2962_p2, %p3689_p0  ;;  %p3255_p3 = pnand %p2975_p4, %p3217_p5 }
  0x19   : > { %s2952_s9 = smul.u32 1792, %s176_s7  ;;  %p3017_p8 = scmp.ne.s32.totalorder %s3674_s0, %s3016_s12 }
  0x1a   : > { %s3691_s8 = scalar_select %p3255_p3, 1, 0 }
  0x1b   : > { %p3018_p9 = pneg %p3248_p7  ;;  %p3023_p4 = scmp.lt.u32.totalorder %s3016_s12, %s3674_s0 }
  0x1d   : > { %p3019_p10 = pnand %p3018_p9, %p3017_p8 }
  0x1f   : > { %p3020_p2 = pneg %p3019_p10 }
  0x21   : > { %p3025_p5 = pnand %p3023_p4, %p3020_p2 }
  0x23   : > { %3028 = shalt.err (!%p3025_p5)
}
  0x24   : > { %s3029_s23 = scalar_lea.vmem %s166_s5, 64  ;;  %p3037_p11 = scmp.lt.s32.totalorder %s166_s5, %s166_s5 }
  0x25   : > { %p3030_p0 = scmp.ne.s32.totalorder %s166_s5, %s3029_s23  ;;  %p3038_p6 = scmp.lt.s32.totalorder %s3029_s23, %s3029_s23 }
  0x27   : > { %p3032_p1 = pnand %p3030_p0, %p3018_p9  ;;  %p3039_p13 = por %p3038_p6, %p3037_p11 }
  0x29   : > { %p3033_p12 = pneg %p3032_p1 }
  0x2b   : > { %p3040_p3 = pnand %p3039_p13, %p3033_p12 }
  0x2d   : > { %3043 = shalt.err (!%p3040_p3)
}
  0x2e   : > { %2965 = dma.hbm_to_vmem [thread:$0]  (!%p3248_p7), %s3674_s0, 64, %s166_s5, [#allocation3]  }
  0x2f   : > { %s2934_s10 = sshll.u32 %s3144_s18, 11  ;;  %s180_s11 = scalar_lea.vmem [#allocation5], %s2952_s9 }
  0x30   : > { %s187_s12 = sshll.u32 %s180_s11, 4  ;;  %s3279_s20 = scalar_lea.hbm %s3675_s1, %s2934_s10  ;;  %s3281_s12 = int_to_ptr.vmem [resolvable:$true] %s187_s12 }
  0x31   : > { %s3283_s6 = scalar_lea.sflag [#allocation6], %s176_s7  ;;  %s3044_s22 = scalar_lea.hbm %s3279_s20, 28672 }
  0x32   : > { %p3045_p6 = scmp.ne.s32.totalorder %s3279_s20, %s3044_s22  ;;  %p3692_p11 = scmp.ne.s32.totalorder %s3691_s8, 0 }
  0x33   : > { %s3049_s23 = scalar_lea.hbm %s3675_s1, 57344  ;;  %p3050_p7 = scmp.lt.u32.totalorder %s3279_s20, %s3675_s1 }
  0x34   : > { %p3046_p12 = pneg %p3692_p11  ;;  %p3051_p3 = scmp.lt.u32.totalorder %s3049_s23, %s3044_s22 }
  0x35   : > { %p3053_p9 = scmp.lt.u32.totalorder %s3044_s22, %s3279_s20 }
  0x36   : > { %p3047_p13 = pnand %p3046_p12, %p3045_p6  ;;  %p3052_p8 = por %p3051_p3, %p3050_p7 }
  0x38   : > { %p3048_p1 = pneg %p3047_p13  ;;  %p3054_p10 = por %p3053_p9, %p3052_p8 }
  0x3a   : > { %p3055_p2 = pnand %p3054_p10, %p3048_p1 }
  0x3c   : > { %3058 = shalt.err (!%p3055_p2)
}
  0x3d   : > { %s3059_s7 = scalar_lea.vmem %s3281_s12, 28672  ;;  %s3147_s10 = smov [#allocation5]  }
  0x3e   : > { %p3060_p4 = scmp.ne.s32.totalorder %s3281_s12, %s3059_s7  ;;  %s3064_s11 = sshll.u32 %s3147_s10, 4  ;;  %s3065_s11 = int_to_ptr.vmem [resolvable:$false] %s3064_s11 }
  0x3f   : > { %s3066_s13 = scalar_lea.vmem %s3065_s11, 57344  ;;  %p3067_p6 = scmp.lt.s32.totalorder %s3281_s12, %s3065_s11 }
  0x40   : > { %p3062_p5 = pnand %p3060_p4, %p3046_p12  ;;  %p3068_p13 = scmp.lt.s32.totalorder %s3066_s13, %s3059_s7 }
  0x42   : > { %p3063_p0 = pneg %p3062_p5  ;;  %p3069_p7 = por %p3068_p13, %p3067_p6 }
  0x44   : > { %p3070_p3 = pnand %p3069_p7, %p3063_p0 }
  0x46   : > { %3073 = shalt.err (!%p3070_p3)
}
  0x47   : > { %s3148_s14 = smov 4096   ;;  %s3149_s22 = smov 2048  }
  0x48   : > { %s3150_s5 = smov 128   ;;  %p3693_p12 = scmp.ne.s32.totalorder %s3688_s29, 0 }
  0x49   : > { %2969 = dma.hbm_to_vmem [thread:$0]  (!%p3692_p11), %s3279_s20, 28672, %s3281_s12, %s3283_s6, %s3148_s14, %s3149_s22, %s3150_s5  }
  0x4a   : > { %199 = sbr.rel (%p3693_p12) target bundleno = 682 (0x2aa), region = 28  ;;  %p3694_p1 = scmp.eq.s32.totalorder (!%p3693_p12), %s3199_s19, 0 }
  0x51   : > { %3119 = dma.done.wait (%p3694_p1), [#allocation3], 64   ;;  %p3695_p8 = pmov %p3694_p1 }
  0x52   : > { %s3318_s9 = sand.u32 1, %s3136_s16   ;;  %p3696_p11 = scmp.ne.s32.totalorder %s3685_s26, 0 }
  0x53   : > { %3121 = vsyncadd (%p3695_p8), [#allocation3], 4294967232  ;;  %s2953_s23 = smul.u32 1792, %s3318_s9  ;;  %s206_s25 = scalar_lea.sflag [#allocation6], %s3318_s9 }
  0x55   : > { %s3322_s30 = scalar_lea.vmem [#allocation5], %s2953_s23 }
  0x56   : > { %3123 = dma.done.wait (%p3696_p11), %s206_s25, 28672  }
  0x57   : > { %3125 = vsyncadd (%p3696_p11), %s206_s25, 4294938624  ;;  %v3151_v0 = vmov 0   ;;  %v254_v1 = vld [vmem:[%s3322_s30] sm:$0xff]  ;;  %v255_v3 = vld [vmem:[%s3322_s30 + $0x8] sm:$0xff]  ;;  %vm1598_vm0 = vcmask 916480   ;;  %s2670_s26 = sshll.u32 %s3318_s9, 7 }
  0x58   : > { %1634 = vmatprep.mubr.bf16.mxu0 %v3151_v0  ;;  %1675 = vmatprep.mubr.bf16.mxu1 %v3151_v0  ;;  %v270_v2 = vld [vmem:[%s3322_s30 + $0x80] sm:$0xff]  ;;  %v271_v6 = vld [vmem:[%s3322_s30 + $0x88] sm:$0xff]  ;;  %v256_v55 = vld [vmem:[%s3322_s30 + $0x10] sm:$0xff]  ;;  %s3605_s29 = scalar_lea.vmem [#allocation7], %s2670_s26  ;;  %s2951_s8 = sshll.u32 %s3199_s19, 11 }
  0x59   : > { %v2674_v4 = vcombine.high %v254_v1, %v270_v2  ;;  %v2673_v5 = vcombine.low %v254_v1, %v270_v2  ;;  %v286_v7 = vld [vmem:[%s3322_s30 + $0x100] sm:$0xff]  ;;  %v2676_v9 = vcombine.high %v255_v3, %v271_v6  ;;  %v2675_v10 = vcombine.low %v255_v3, %v271_v6  ;;  %v287_v12 = vld [vmem:[%s3322_s30 + $0x108] sm:$0xff]  ;;  %v272_v56 = vld [vmem:[%s3322_s30 + $0x90] sm:$0xff]  ;;  %s2526_s12 = sshll.u32 %s3605_s29, 4  ;;  %s3628_s7 = scalar_lea.hbm %s3676_s2, %s2951_s8  ;;  %s2527_s12 = int_to_ptr.vmem [resolvable:$true] %s2526_s12 }
  0x5a   : > { %v302_v8 = vld [vmem:[%s3322_s30 + $0x180] sm:$0xff]  ;;  %v303_v13 = vld [vmem:[%s3322_s30 + $0x188] sm:$0xff]  ;;  %v257_v57 = vld [vmem:[%s3322_s30 + $0x18] sm:$0xff]  ;;  %v2678_v61 = vcombine.high %v256_v55, %v272_v56  ;;  %s2504_s10 = scalar_lea.sflag [#allocation4], %s3318_s9  ;;  %s3074_s11 = scalar_lea.vmem %s2527_s12, 2048 }
  0x5b   : > { %v2706_v11 = vcombine.high %v286_v7, %v302_v8  ;;  %v318_v14 = vld [vmem:[%s3322_s30 + $0x200] sm:$0xff]  ;;  %1602 = vmatprep.subr.bf16.mxu0 %v2674_v4  ;;  %v2708_v15 = vcombine.high %v287_v12, %v303_v13  ;;  %v319_v17 = vld [vmem:[%s3322_s30 + $0x208] sm:$0xff]  ;;  %1643 = vmatprep.subr.bf16.mxu1 %v2676_v9  ;;  %v2705_v19 = vcombine.low %v286_v7, %v302_v8  ;;  %v273_v58 = vld [vmem:[%s3322_s30 + $0x98] sm:$0xff]  ;;  %p3075_p9 = scmp.ne.s32.totalorder %s2527_s12, %s3074_s11  ;;  %p3697_p10 = scmp.ne.s32.totalorder %s3686_s27, 0 }
  0x5c   : > { %v334_v16 = vld [vmem:[%s3322_s30 + $0x280] sm:$0xff]  ;;  %v335_v18 = vld [vmem:[%s3322_s30 + $0x288] sm:$0xff]  ;;  %1603 = vmatpush1.bf16.msra.mxu0 %v2673_v5  ;;  %1644 = vmatpush1.bf16.msra.mxu1 %v2675_v10  ;;  %v2707_v20 = vcombine.low %v287_v12, %v303_v13  ;;  %v2680_v62 = vcombine.high %v257_v57, %v273_v58  ;;  %v288_v63 = vld [vmem:[%s3322_s30 + $0x110] sm:$0xff]  ;;  %v2677_v5 = vcombine.low %v256_v55, %v272_v56  ;;  %s3152_s13 = smov [#allocation7]  }
  0x5d   : > { %1604 = vmatprep.subr.bf16.mxu0 %v2706_v11  ;;  %v2738_v21 = vcombine.high %v318_v14, %v334_v16  ;;  %1645 = vmatprep.subr.bf16.mxu1 %v2708_v15  ;;  %v2740_v22 = vcombine.high %v319_v17, %v335_v18  ;;  %v350_v23 = vld [vmem:[%s3322_s30 + $0x300] sm:$0xff]  ;;  %v351_v25 = vld [vmem:[%s3322_s30 + $0x308] sm:$0xff]  ;;  %v2737_v27 = vcombine.low %v318_v14, %v334_v16  ;;  %v304_v1 = vld [vmem:[%s3322_s30 + $0x190] sm:$0xff]  ;;  %p3076_p2 = pnand %p3075_p9, %p3697_p10  ;;  %s3078_s14 = sshll.u32 %s3152_s13, 4  ;;  %s3079_s14 = int_to_ptr.vmem [resolvable:$false] %s3078_s14 }
  0x5e   : > { %v366_v24 = vld [vmem:[%s3322_s30 + $0x380] sm:$0xff]  ;;  %v367_v26 = vld [vmem:[%s3322_s30 + $0x388] sm:$0xff]  ;;  %v2739_v28 = vcombine.low %v319_v17, %v335_v18  ;;  %v289_v2 = vld [vmem:[%s3322_s30 + $0x118] sm:$0xff]  ;;  %v2679_v6 = vcombine.low %v257_v57, %v273_v58  ;;  %v2710_v7 = vcombine.high %v288_v63, %v304_v1  ;;  %v2709_v13 = vcombine.low %v288_v63, %v304_v1  ;;  %s3080_s22 = scalar_lea.vmem %s3079_s14, 4096  ;;  %p3081_p5 = scmp.lt.s32.totalorder %s2527_s12, %s3079_s14 }
  0x5f   : > { %v2770_v29 = vcombine.high %v350_v23, %v366_v24  ;;  %v2772_v30 = vcombine.high %v351_v25, %v367_v26  ;;  %v382_v31 = vld [vmem:[%s3322_s30 + $0x400] sm:$0xff]  ;;  %v383_v33 = vld [vmem:[%s3322_s30 + $0x408] sm:$0xff]  ;;  %v2769_v35 = vcombine.low %v350_v23, %v366_v24  ;;  %v2771_v36 = vcombine.low %v351_v25, %v367_v26  ;;  %v305_v3 = vld [vmem:[%s3322_s30 + $0x198] sm:$0xff]  ;;  %p3077_p4 = pneg %p3076_p2  ;;  %p3082_p0 = scmp.lt.s32.totalorder %s3080_s22, %s3074_s11 }
  0x60   : > { %1605 = vmatpush1.bf16.msra.mxu0 %v2705_v19  ;;  %1646 = vmatpush1.bf16.msra.mxu1 %v2707_v20  ;;  %v398_v32 = vld [vmem:[%s3322_s30 + $0x480] sm:$0xff]  ;;  %v399_v34 = vld [vmem:[%s3322_s30 + $0x488] sm:$0xff]  ;;  %v3366_v4 = vld [vmem:[#allocation2] sm:$0xf]  ;;  %v2712_v8 = vcombine.high %v289_v2, %v305_v3  ;;  %v2711_v14 = vcombine.low %v289_v2, %v305_v3 }
  0x61   : > { %1606 = vmatprep.subr.bf16.mxu0 %v2738_v21  ;;  %1647 = vmatprep.subr.bf16.mxu1 %v2740_v22  ;;  %v2802_v37 = vcombine.high %v382_v31, %v398_v32  ;;  %v2804_v38 = vcombine.high %v383_v33, %v399_v34  ;;  %v414_v39 = vld [vmem:[%s3322_s30 + $0x500] sm:$0xff]  ;;  %v415_v41 = vld [vmem:[%s3322_s30 + $0x508] sm:$0xff]  ;;  %v2801_v43 = vcombine.low %v382_v31, %v398_v32  ;;  %v320_v9 = vld [vmem:[%s3322_s30 + $0x210] sm:$0xff]  ;;  %p3083_p6 = por %p3082_p0, %p3081_p5 }
  0x62   : > { %v430_v40 = vld [vmem:[%s3322_s30 + $0x580] sm:$0xff]  ;;  %v431_v42 = vld [vmem:[%s3322_s30 + $0x588] sm:$0xff]  ;;  %v2803_v44 = vcombine.low %v383_v33, %v399_v34  ;;  %v336_v10 = vld [vmem:[%s3322_s30 + $0x290] sm:$0xff] }
  0x63   : > { %v2834_v45 = vcombine.high %v414_v39, %v430_v40  ;;  %v2836_v46 = vcombine.high %v415_v41, %v431_v42  ;;  %v446_v47 = vld [vmem:[%s3322_s30 + $0x600] sm:$0xff]  ;;  %v447_v49 = vld [vmem:[%s3322_s30 + $0x608] sm:$0xff]  ;;  %v2833_v51 = vcombine.low %v414_v39, %v430_v40  ;;  %v2835_v52 = vcombine.low %v415_v41, %v431_v42  ;;  %v321_v11 = vld [vmem:[%s3322_s30 + $0x218] sm:$0xff]  ;;  %p3084_p13 = pnand %p3083_p6, %p3077_p4 }
  0x64   : > { %1607 = vmatpush1.bf16.msra.mxu0 %v2737_v27  ;;  %1648 = vmatpush1.bf16.msra.mxu1 %v2739_v28  ;;  %v462_v48 = vld [vmem:[%s3322_s30 + $0x680] sm:$0xff]  ;;  %v463_v50 = vld [vmem:[%s3322_s30 + $0x688] sm:$0xff]  ;;  %v337_v12 = vld [vmem:[%s3322_s30 + $0x298] sm:$0xff]  ;;  %v2742_v15 = vcombine.high %v320_v9, %v336_v10  ;;  %v2741_v21 = vcombine.low %v320_v9, %v336_v10 }
  0x65   : > { %1608 = vmatprep.subr.bf16.mxu0 %v2770_v29  ;;  %1649 = vmatprep.subr.bf16.mxu1 %v2772_v30  ;;  %v2866_v53 = vcombine.high %v446_v47, %v462_v48  ;;  %v2868_v54 = vcombine.high %v447_v49, %v463_v50  ;;  %v2865_v59 = vcombine.low %v446_v47, %v462_v48  ;;  %v352_v17 = vld [vmem:[%s3322_s30 + $0x310] sm:$0xff]  ;;  %v353_v19 = vld [vmem:[%s3322_s30 + $0x318] sm:$0xff]  ;;  %v290_v57 = vld [vmem:[%s3322_s30 + $0x120] sm:$0xff] }
  0x66   : > { %v2867_v60 = vcombine.low %v447_v49, %v463_v50  ;;  %v2744_v16 = vcombine.high %v321_v11, %v337_v12  ;;  %v368_v18 = vld [vmem:[%s3322_s30 + $0x390] sm:$0xff]  ;;  %v369_v20 = vld [vmem:[%s3322_s30 + $0x398] sm:$0xff]  ;;  %v2743_v22 = vcombine.low %v321_v11, %v337_v12  ;;  %v258_v49 = vld [vmem:[%s3322_s30 + $0x20] sm:$0xff] }
  0x67   : > { %v2774_v23 = vcombine.high %v352_v17, %v368_v18  ;;  %v2776_v24 = vcombine.high %v353_v19, %v369_v20  ;;  %v384_v25 = vld [vmem:[%s3322_s30 + $0x410] sm:$0xff]  ;;  %v385_v27 = vld [vmem:[%s3322_s30 + $0x418] sm:$0xff]  ;;  %v2773_v29 = vcombine.low %v352_v17, %v368_v18  ;;  %v2775_v30 = vcombine.low %v353_v19, %v369_v20  ;;  %v274_v50 = vld [vmem:[%s3322_s30 + $0xa0] sm:$0xff] }
  0x68   : > { %1609 = vmatpush1.bf16.msra.mxu0 %v2769_v35  ;;  %1650 = vmatpush1.bf16.msra.mxu1 %v2771_v36  ;;  %v400_v26 = vld [vmem:[%s3322_s30 + $0x490] sm:$0xff]  ;;  %v401_v28 = vld [vmem:[%s3322_s30 + $0x498] sm:$0xff]  ;;  %v2682_v55 = vcombine.high %v258_v49, %v274_v50  ;;  %v306_v58 = vld [vmem:[%s3322_s30 + $0x1a0] sm:$0xff] }
  0x69   : > { %1610 = vmatprep.subr.bf16.mxu0 %v2802_v37  ;;  %1651 = vmatprep.subr.bf16.mxu1 %v2804_v38  ;;  %v2806_v31 = vcombine.high %v384_v25, %v400_v26  ;;  %v2808_v32 = vcombine.high %v385_v27, %v401_v28  ;;  %v416_v33 = vld [vmem:[%s3322_s30 + $0x510] sm:$0xff]  ;;  %v417_v35 = vld [vmem:[%s3322_s30 + $0x518] sm:$0xff]  ;;  %v2805_v37 = vcombine.low %v384_v25, %v400_v26  ;;  %v322_v2 = vld [vmem:[%s3322_s30 + $0x220] sm:$0xff] }
  0x6a   : > { %v432_v34 = vld [vmem:[%s3322_s30 + $0x590] sm:$0xff]  ;;  %v433_v36 = vld [vmem:[%s3322_s30 + $0x598] sm:$0xff]  ;;  %v2807_v38 = vcombine.low %v385_v27, %v401_v28  ;;  %v2714_v63 = vcombine.high %v290_v57, %v306_v58  ;;  %v338_v3 = vld [vmem:[%s3322_s30 + $0x2a0] sm:$0xff] }
  0x6b   : > { %v2838_v39 = vcombine.high %v416_v33, %v432_v34  ;;  %v2840_v40 = vcombine.high %v417_v35, %v433_v36  ;;  %v448_v41 = vld [vmem:[%s3322_s30 + $0x610] sm:$0xff]  ;;  %v2746_v9 = vcombine.high %v322_v2, %v338_v3  ;;  %v354_v11 = vld [vmem:[%s3322_s30 + $0x320] sm:$0xff] }
  0x6c   : > { %1611 = vmatpush1.bf16.msra.mxu0 %v2801_v43  ;;  %1652 = vmatpush1.bf16.msra.mxu1 %v2803_v44  ;;  %v464_v42 = vld [vmem:[%s3322_s30 + $0x690] sm:$0xff]  ;;  %v449_v43 = vld [vmem:[%s3322_s30 + $0x618] sm:$0xff]  ;;  %v370_v12 = vld [vmem:[%s3322_s30 + $0x3a0] sm:$0xff] }
  0x6d   : > { %1612 = vmatprep.subr.bf16.mxu0 %v2834_v45  ;;  %1653 = vmatprep.subr.bf16.mxu1 %v2836_v46  ;;  %v465_v44 = vld [vmem:[%s3322_s30 + $0x698] sm:$0xff]  ;;  %v2837_v45 = vcombine.low %v416_v33, %v432_v34  ;;  %v2839_v46 = vcombine.low %v417_v35, %v433_v36  ;;  %v2870_v47 = vcombine.high %v448_v41, %v464_v42  ;;  %v386_v19 = vld [vmem:[%s3322_s30 + $0x420] sm:$0xff] }
  0x6e   : > { %v2872_v48 = vcombine.high %v449_v43, %v465_v44  ;;  %v2778_v17 = vcombine.high %v354_v11, %v370_v12  ;;  %v402_v20 = vld [vmem:[%s3322_s30 + $0x4a0] sm:$0xff] }
  0x6f   : > { %v2810_v25 = vcombine.high %v386_v19, %v402_v20  ;;  %v418_v27 = vld [vmem:[%s3322_s30 + $0x520] sm:$0xff] }
  0x70   : > { %1613 = vmatpush1.bf16.msra.mxu0 %v2833_v51  ;;  %1654 = vmatpush1.bf16.msra.mxu1 %v2835_v52  ;;  %v259_v51 = vld [vmem:[%s3322_s30 + $0x28] sm:$0xff]  ;;  %v434_v28 = vld [vmem:[%s3322_s30 + $0x5a0] sm:$0xff] }
  0x71   : > { %1614 = vmatprep.subr.bf16.mxu0 %v2866_v53  ;;  %1655 = vmatprep.subr.bf16.mxu1 %v2868_v54  ;;  %v275_v52 = vld [vmem:[%s3322_s30 + $0xa8] sm:$0xff]  ;;  %v2869_v53 = vcombine.low %v448_v41, %v464_v42  ;;  %v2871_v54 = vcombine.low %v449_v43, %v465_v44  ;;  %v2842_v33 = vcombine.high %v418_v27, %v434_v28  ;;  %v450_v35 = vld [vmem:[%s3322_s30 + $0x620] sm:$0xff]  ;;  %v260_v43 = vld [vmem:[%s3322_s30 + $0x30] sm:$0xff] }
  0x72   : > { %v2684_v56 = vcombine.high %v259_v51, %v275_v52  ;;  %v466_v36 = vld [vmem:[%s3322_s30 + $0x6a0] sm:$0xff]  ;;  %v276_v44 = vld [vmem:[%s3322_s30 + $0xb0] sm:$0xff] }
  0x73   : > { %v2874_v41 = vcombine.high %v450_v35, %v466_v36 }
  0x74   : > { %1615 = vmatpush1.bf16.msra.mxu0 %v2865_v59  ;;  %1656 = vmatpush1.bf16.msra.mxu1 %v2867_v60  ;;  %v291_v59 = vld [vmem:[%s3322_s30 + $0x128] sm:$0xff] }
  0x75   : > { %1684 = vmatprep.subr.bf16.mxu0 %v2678_v61  ;;  %1725 = vmatprep.subr.bf16.mxu1 %v2680_v62  ;;  %v307_v60 = vld [vmem:[%s3322_s30 + $0x1a8] sm:$0xff]  ;;  %v2681_v61 = vcombine.low %v258_v49, %v274_v50  ;;  %v2683_v62 = vcombine.low %v259_v51, %v275_v52  ;;  %v2686_v49 = vcombine.high %v260_v43, %v276_v44  ;;  %v292_v51 = vld [vmem:[%s3322_s30 + $0x130] sm:$0xff] }
  0x76   : > { %v2716_v1 = vcombine.high %v291_v59, %v307_v60  ;;  %v308_v52 = vld [vmem:[%s3322_s30 + $0x1b0] sm:$0xff] }
  0x77   : > { %2897 = vmatmul.mubr.msk.bf16.vlgmr.msra.gmra.mrb[0].mxu0 %vm1598_vm0, %v3366_v4  ;;  %2898 = vmatmul.mubr.msk.bf16.vlgmr.msra.gmra.mrb[0].mxu1 %vm1598_vm0, %v3366_v4 }
  0x78   : > { %1685 = vmatpush1.bf16.msra.mxu0 %v2677_v5  ;;  %1726 = vmatpush1.bf16.msra.mxu1 %v2679_v6  ;;  %v323_v5 = vld [vmem:[%s3322_s30 + $0x228] sm:$0xff] }
  0x79   : > { %1686 = vmatprep.subr.bf16.mxu0 %v2710_v7  ;;  %1727 = vmatprep.subr.bf16.mxu1 %v2712_v8  ;;  %v339_v6 = vld [vmem:[%s3322_s30 + $0x2a8] sm:$0xff]  ;;  %v2713_v7 = vcombine.low %v290_v57, %v306_v58  ;;  %v2715_v8 = vcombine.low %v291_v59, %v307_v60  ;;  %v2718_v57 = vcombine.high %v292_v51, %v308_v52  ;;  %v324_v59 = vld [vmem:[%s3322_s30 + $0x230] sm:$0xff] }
  0x7a   : > { %1716 = vmatprep.mubr.bf16.mxu0 %v3151_v0  ;;  %1757 = vmatprep.mubr.bf16.mxu1 %v3151_v0  ;;  %v2748_v10 = vcombine.high %v323_v5, %v339_v6  ;;  %v340_v60 = vld [vmem:[%s3322_s30 + $0x2b0] sm:$0xff] }
  0x7c   : > { %1687 = vmatpush1.bf16.msra.mxu0 %v2709_v13  ;;  %1728 = vmatpush1.bf16.msra.mxu1 %v2711_v14  ;;  %v355_v13 = vld [vmem:[%s3322_s30 + $0x328] sm:$0xff] }
  0x7d   : > { %1688 = vmatprep.subr.bf16.mxu0 %v2742_v15  ;;  %1729 = vmatprep.subr.bf16.mxu1 %v2744_v16  ;;  %v371_v14 = vld [vmem:[%s3322_s30 + $0x3a8] sm:$0xff]  ;;  %v2745_v15 = vcombine.low %v322_v2, %v338_v3  ;;  %v2747_v16 = vcombine.low %v323_v5, %v339_v6  ;;  %v2750_v2 = vcombine.high %v324_v59, %v340_v60  ;;  %v356_v5 = vld [vmem:[%s3322_s30 + $0x330] sm:$0xff] }
  0x7e   : > { %v2780_v18 = vcombine.high %v355_v13, %v371_v14  ;;  %v372_v6 = vld [vmem:[%s3322_s30 + $0x3b0] sm:$0xff] }
  0x80   : > { %1689 = vmatpush1.bf16.msra.mxu0 %v2741_v21  ;;  %1730 = vmatpush1.bf16.msra.mxu1 %v2743_v22  ;;  %v387_v21 = vld [vmem:[%s3322_s30 + $0x428] sm:$0xff] }
  0x81   : > { %1690 = vmatprep.subr.bf16.mxu0 %v2774_v23  ;;  %1731 = vmatprep.subr.bf16.mxu1 %v2776_v24  ;;  %v403_v22 = vld [vmem:[%s3322_s30 + $0x4a8] sm:$0xff]  ;;  %v2777_v23 = vcombine.low %v354_v11, %v370_v12  ;;  %v2779_v24 = vcombine.low %v355_v13, %v371_v14  ;;  %v2782_v11 = vcombine.high %v356_v5, %v372_v6  ;;  %v388_v13 = vld [vmem:[%s3322_s30 + $0x430] sm:$0xff] }
  0x82   : > { %v2812_v26 = vcombine.high %v387_v21, %v403_v22  ;;  %v404_v14 = vld [vmem:[%s3322_s30 + $0x4b0] sm:$0xff] }
  0x84   : > { %1691 = vmatpush1.bf16.msra.mxu0 %v2773_v29  ;;  %1732 = vmatpush1.bf16.msra.mxu1 %v2775_v30  ;;  %v419_v29 = vld [vmem:[%s3322_s30 + $0x528] sm:$0xff] }
  0x85   : > { %1692 = vmatprep.subr.bf16.mxu0 %v2806_v31  ;;  %1733 = vmatprep.subr.bf16.mxu1 %v2808_v32  ;;  %v435_v30 = vld [vmem:[%s3322_s30 + $0x5a8] sm:$0xff]  ;;  %v2809_v31 = vcombine.low %v386_v19, %v402_v20  ;;  %v2811_v32 = vcombine.low %v387_v21, %v403_v22  ;;  %v2814_v19 = vcombine.high %v388_v13, %v404_v14  ;;  %v420_v21 = vld [vmem:[%s3322_s30 + $0x530] sm:$0xff] }
  0x86   : > { %v2844_v34 = vcombine.high %v419_v29, %v435_v30  ;;  %v436_v22 = vld [vmem:[%s3322_s30 + $0x5b0] sm:$0xff] }
  0x88   : > { %1693 = vmatpush1.bf16.msra.mxu0 %v2805_v37  ;;  %1734 = vmatpush1.bf16.msra.mxu1 %v2807_v38  ;;  %v451_v37 = vld [vmem:[%s3322_s30 + $0x628] sm:$0xff] }
  0x89   : > { %1694 = vmatprep.subr.bf16.mxu0 %v2838_v39  ;;  %1735 = vmatprep.subr.bf16.mxu1 %v2840_v40  ;;  %v467_v38 = vld [vmem:[%s3322_s30 + $0x6a8] sm:$0xff]  ;;  %v2841_v39 = vcombine.low %v418_v27, %v434_v28  ;;  %v2843_v40 = vcombine.low %v419_v29, %v435_v30  ;;  %v2846_v27 = vcombine.high %v420_v21, %v436_v22  ;;  %v452_v29 = vld [vmem:[%s3322_s30 + $0x630] sm:$0xff] }
  0x8a   : > { %v2876_v42 = vcombine.high %v451_v37, %v467_v38  ;;  %v468_v30 = vld [vmem:[%s3322_s30 + $0x6b0] sm:$0xff] }
  0x8c   : > { %1695 = vmatpush1.bf16.msra.mxu0 %v2837_v45  ;;  %1736 = vmatpush1.bf16.msra.mxu1 %v2839_v46  ;;  %v261_v45 = vld [vmem:[%s3322_s30 + $0x38] sm:$0xff] }
  0x8d   : > { %1696 = vmatprep.subr.bf16.mxu0 %v2870_v47  ;;  %1737 = vmatprep.subr.bf16.mxu1 %v2872_v48  ;;  %v277_v46 = vld [vmem:[%s3322_s30 + $0xb8] sm:$0xff]  ;;  %v2873_v47 = vcombine.low %v450_v35, %v466_v36  ;;  %v2875_v48 = vcombine.low %v451_v37, %v467_v38  ;;  %v2878_v35 = vcombine.high %v452_v29, %v468_v30  ;;  %v262_v37 = vld [vmem:[%s3322_s30 + $0x40] sm:$0xff] }
  0x8e   : > { %v2688_v50 = vcombine.high %v261_v45, %v277_v46  ;;  %v278_v38 = vld [vmem:[%s3322_s30 + $0xc0] sm:$0xff] }
  0x90   : > { %1697 = vmatpush1.bf16.msra.mxu0 %v2869_v53  ;;  %1738 = vmatpush1.bf16.msra.mxu1 %v2871_v54  ;;  %v293_v53 = vld [vmem:[%s3322_s30 + $0x138] sm:$0xff] }
  0x91   : > { %1766 = vmatprep.subr.bf16.mxu0 %v2682_v55  ;;  %1807 = vmatprep.subr.bf16.mxu1 %v2684_v56  ;;  %v309_v54 = vld [vmem:[%s3322_s30 + $0x1b8] sm:$0xff]  ;;  %v2685_v55 = vcombine.low %v260_v43, %v276_v44  ;;  %v2687_v56 = vcombine.low %v261_v45, %v277_v46  ;;  %v2690_v43 = vcombine.high %v262_v37, %v278_v38  ;;  %v294_v45 = vld [vmem:[%s3322_s30 + $0x140] sm:$0xff] }
  0x92   : > { %v2720_v58 = vcombine.high %v293_v53, %v309_v54  ;;  %v310_v46 = vld [vmem:[%s3322_s30 + $0x1c0] sm:$0xff] }
  0x93   : > { %2899 = vmatmul.mubr.msk.bf16.vlgmr.msra.gmra.mrb[4].mxu0 %vm1598_vm0, %v3366_v4  ;;  %2900 = vmatmul.mubr.msk.bf16.vlgmr.msra.gmra.mrb[4].mxu1 %vm1598_vm0, %v3366_v4 }
  0x94   : > { %1767 = vmatpush1.bf16.msra.mxu0 %v2681_v61  ;;  %1808 = vmatpush1.bf16.msra.mxu1 %v2683_v62  ;;  %v325_v61 = vld [vmem:[%s3322_s30 + $0x238] sm:$0xff] }
  0x95   : > { %1768 = vmatprep.subr.bf16.mxu0 %v2714_v63  ;;  %1809 = vmatprep.subr.bf16.mxu1 %v2716_v1  ;;  %v341_v62 = vld [vmem:[%s3322_s30 + $0x2b8] sm:$0xff]  ;;  %v2717_v63 = vcombine.low %v292_v51, %v308_v52  ;;  %v2719_v1 = vcombine.low %v293_v53, %v309_v54  ;;  %v2722_v51 = vcombine.high %v294_v45, %v310_v46  ;;  %v326_v53 = vld [vmem:[%s3322_s30 + $0x240] sm:$0xff] }
  0x96   : > { %1798 = vmatprep.mubr.bf16.mxu0 %v3151_v0  ;;  %1839 = vmatprep.mubr.bf16.mxu1 %v3151_v0  ;;  %v2752_v3 = vcombine.high %v325_v61, %v341_v62  ;;  %v342_v54 = vld [vmem:[%s3322_s30 + $0x2c0] sm:$0xff] }
  0x98   : > { %1769 = vmatpush1.bf16.msra.mxu0 %v2713_v7  ;;  %1810 = vmatpush1.bf16.msra.mxu1 %v2715_v8  ;;  %v357_v7 = vld [vmem:[%s3322_s30 + $0x338] sm:$0xff] }
  0x99   : > { %1770 = vmatprep.subr.bf16.mxu0 %v2746_v9  ;;  %1811 = vmatprep.subr.bf16.mxu1 %v2748_v10  ;;  %v373_v8 = vld [vmem:[%s3322_s30 + $0x3b8] sm:$0xff]  ;;  %v2749_v9 = vcombine.low %v324_v59, %v340_v60  ;;  %v2751_v10 = vcombine.low %v325_v61, %v341_v62  ;;  %v2754_v59 = vcombine.high %v326_v53, %v342_v54  ;;  %v358_v61 = vld [vmem:[%s3322_s30 + $0x340] sm:$0xff] }
  0x9a   : > { %v2784_v12 = vcombine.high %v357_v7, %v373_v8  ;;  %v374_v62 = vld [vmem:[%s3322_s30 + $0x3c0] sm:$0xff] }
  0x9c   : > { %1771 = vmatpush1.bf16.msra.mxu0 %v2745_v15  ;;  %1812 = vmatpush1.bf16.msra.mxu1 %v2747_v16  ;;  %v389_v15 = vld [vmem:[%s3322_s30 + $0x438] sm:$0xff] }
  0x9d   : > { %1772 = vmatprep.subr.bf16.mxu0 %v2778_v17  ;;  %1813 = vmatprep.subr.bf16.mxu1 %v2780_v18  ;;  %v405_v16 = vld [vmem:[%s3322_s30 + $0x4b8] sm:$0xff]  ;;  %v2781_v17 = vcombine.low %v356_v5, %v372_v6  ;;  %v2783_v18 = vcombine.low %v357_v7, %v373_v8  ;;  %v2786_v5 = vcombine.high %v358_v61, %v374_v62  ;;  %v390_v7 = vld [vmem:[%s3322_s30 + $0x440] sm:$0xff] }
  0x9e   : > { %v2816_v20 = vcombine.high %v389_v15, %v405_v16  ;;  %v406_v8 = vld [vmem:[%s3322_s30 + $0x4c0] sm:$0xff] }
  0xa0   : > { %1773 = vmatpush1.bf16.msra.mxu0 %v2777_v23  ;;  %1814 = vmatpush1.bf16.msra.mxu1 %v2779_v24  ;;  %v421_v23 = vld [vmem:[%s3322_s30 + $0x538] sm:$0xff] }
  0xa1   : > { %1774 = vmatprep.subr.bf16.mxu0 %v2810_v25  ;;  %1815 = vmatprep.subr.bf16.mxu1 %v2812_v26  ;;  %v437_v24 = vld [vmem:[%s3322_s30 + $0x5b8] sm:$0xff]  ;;  %v2813_v25 = vcombine.low %v388_v13, %v404_v14  ;;  %v2815_v26 = vcombine.low %v389_v15, %v405_v16  ;;  %v2818_v13 = vcombine.high %v390_v7, %v406_v8  ;;  %v422_v15 = vld [vmem:[%s3322_s30 + $0x540] sm:$0xff] }
  0xa2   : > { %v2848_v28 = vcombine.high %v421_v23, %v437_v24  ;;  %v438_v16 = vld [vmem:[%s3322_s30 + $0x5c0] sm:$0xff] }
  0xa4   : > { %1775 = vmatpush1.bf16.msra.mxu0 %v2809_v31  ;;  %1816 = vmatpush1.bf16.msra.mxu1 %v2811_v32  ;;  %v453_v31 = vld [vmem:[%s3322_s30 + $0x638] sm:$0xff] }
  0xa5   : > { %1776 = vmatprep.subr.bf16.mxu0 %v2842_v33  ;;  %1817 = vmatprep.subr.bf16.mxu1 %v2844_v34  ;;  %v469_v32 = vld [vmem:[%s3322_s30 + $0x6b8] sm:$0xff]  ;;  %v2845_v33 = vcombine.low %v420_v21, %v436_v22  ;;  %v2847_v34 = vcombine.low %v421_v23, %v437_v24  ;;  %v2850_v21 = vcombine.high %v422_v15, %v438_v16  ;;  %v454_v23 = vld [vmem:[%s3322_s30 + $0x640] sm:$0xff] }
  0xa6   : > { %v2880_v36 = vcombine.high %v453_v31, %v469_v32  ;;  %v470_v24 = vld [vmem:[%s3322_s30 + $0x6c0] sm:$0xff] }
  0xa8   : > { %1777 = vmatpush1.bf16.msra.mxu0 %v2841_v39  ;;  %1818 = vmatpush1.bf16.msra.mxu1 %v2843_v40  ;;  %v263_v39 = vld [vmem:[%s3322_s30 + $0x48] sm:$0xff] }
  0xa9   : > { %1778 = vmatprep.subr.bf16.mxu0 %v2874_v41  ;;  %1819 = vmatprep.subr.bf16.mxu1 %v2876_v42  ;;  %v279_v40 = vld [vmem:[%s3322_s30 + $0xc8] sm:$0xff]  ;;  %v2877_v41 = vcombine.low %v452_v29, %v468_v30  ;;  %v2879_v42 = vcombine.low %v453_v31, %v469_v32  ;;  %v2882_v29 = vcombine.high %v454_v23, %v470_v24  ;;  %v264_v31 = vld [vmem:[%s3322_s30 + $0x50] sm:$0xff] }
  0xaa   : > { %v2692_v44 = vcombine.high %v263_v39, %v279_v40  ;;  %v280_v32 = vld [vmem:[%s3322_s30 + $0xd0] sm:$0xff] }
  0xac   : > { %1779 = vmatpush1.bf16.msra.mxu0 %v2873_v47  ;;  %1820 = vmatpush1.bf16.msra.mxu1 %v2875_v48  ;;  %v295_v47 = vld [vmem:[%s3322_s30 + $0x148] sm:$0xff] }
  0xad   : > { %1848 = vmatprep.subr.bf16.mxu0 %v2686_v49  ;;  %1889 = vmatprep.subr.bf16.mxu1 %v2688_v50  ;;  %v311_v48 = vld [vmem:[%s3322_s30 + $0x1c8] sm:$0xff]  ;;  %v2689_v49 = vcombine.low %v262_v37, %v278_v38  ;;  %v2691_v50 = vcombine.low %v263_v39, %v279_v40  ;;  %v2694_v37 = vcombine.high %v264_v31, %v280_v32  ;;  %v296_v39 = vld [vmem:[%s3322_s30 + $0x150] sm:$0xff] }
  0xae   : > { %v2724_v52 = vcombine.high %v295_v47, %v311_v48  ;;  %v312_v40 = vld [vmem:[%s3322_s30 + $0x1d0] sm:$0xff] }
  0xaf   : > { %2901 = vmatmul.mubr.msk.bf16.vlgmr.msra.gmra.mrb[8].mxu0 %vm1598_vm0, %v3366_v4  ;;  %2902 = vmatmul.mubr.msk.bf16.vlgmr.msra.gmra.mrb[8].mxu1 %vm1598_vm0, %v3366_v4 }
  0xb0   : > { %1849 = vmatpush1.bf16.msra.mxu0 %v2685_v55  ;;  %1890 = vmatpush1.bf16.msra.mxu1 %v2687_v56  ;;  %v327_v55 = vld [vmem:[%s3322_s30 + $0x248] sm:$0xff] }
  0xb1   : > { %1850 = vmatprep.subr.bf16.mxu0 %v2718_v57  ;;  %1891 = vmatprep.subr.bf16.mxu1 %v2720_v58  ;;  %v343_v56 = vld [vmem:[%s3322_s30 + $0x2c8] sm:$0xff]  ;;  %v2721_v57 = vcombine.low %v294_v45, %v310_v46  ;;  %v2723_v58 = vcombine.low %v295_v47, %v311_v48  ;;  %v2726_v45 = vcombine.high %v296_v39, %v312_v40  ;;  %v328_v47 = vld [vmem:[%s3322_s30 + $0x250] sm:$0xff] }
  0xb2   : > { %1880 = vmatprep.mubr.bf16.mxu0 %v3151_v0  ;;  %1921 = vmatprep.mubr.bf16.mxu1 %v3151_v0  ;;  %v2756_v60 = vcombine.high %v327_v55, %v343_v56  ;;  %v344_v48 = vld [vmem:[%s3322_s30 + $0x2d0] sm:$0xff] }
  0xb4   : > { %1851 = vmatpush1.bf16.msra.mxu0 %v2717_v63  ;;  %1892 = vmatpush1.bf16.msra.mxu1 %v2719_v1  ;;  %v359_v63 = vld [vmem:[%s3322_s30 + $0x348] sm:$0xff] }
  0xb5   : > { %1852 = vmatprep.subr.bf16.mxu0 %v2750_v2  ;;  %1893 = vmatprep.subr.bf16.mxu1 %v2752_v3  ;;  %v375_v1 = vld [vmem:[%s3322_s30 + $0x3c8] sm:$0xff]  ;;  %v2753_v2 = vcombine.low %v326_v53, %v342_v54  ;;  %v2755_v3 = vcombine.low %v327_v55, %v343_v56  ;;  %v2758_v53 = vcombine.high %v328_v47, %v344_v48  ;;  %v360_v55 = vld [vmem:[%s3322_s30 + $0x350] sm:$0xff] }
  0xb6   : > { %v2788_v6 = vcombine.high %v359_v63, %v375_v1  ;;  %v376_v56 = vld [vmem:[%s3322_s30 + $0x3d0] sm:$0xff] }
  0xb8   : > { %1853 = vmatpush1.bf16.msra.mxu0 %v2749_v9  ;;  %1894 = vmatpush1.bf16.msra.mxu1 %v2751_v10  ;;  %v391_v9 = vld [vmem:[%s3322_s30 + $0x448] sm:$0xff] }
  0xb9   : > { %1854 = vmatprep.subr.bf16.mxu0 %v2782_v11  ;;  %1895 = vmatprep.subr.bf16.mxu1 %v2784_v12  ;;  %v407_v10 = vld [vmem:[%s3322_s30 + $0x4c8] sm:$0xff]  ;;  %v2785_v11 = vcombine.low %v358_v61, %v374_v62  ;;  %v2787_v12 = vcombine.low %v359_v63, %v375_v1  ;;  %v2790_v61 = vcombine.high %v360_v55, %v376_v56  ;;  %v392_v63 = vld [vmem:[%s3322_s30 + $0x450] sm:$0xff] }
  0xba   : > { %v2820_v14 = vcombine.high %v391_v9, %v407_v10  ;;  %v408_v1 = vld [vmem:[%s3322_s30 + $0x4d0] sm:$0xff] }
  0xbc   : > { %1855 = vmatpush1.bf16.msra.mxu0 %v2781_v17  ;;  %1896 = vmatpush1.bf16.msra.mxu1 %v2783_v18  ;;  %v423_v17 = vld [vmem:[%s3322_s30 + $0x548] sm:$0xff] }
  0xbd   : > { %1856 = vmatprep.subr.bf16.mxu0 %v2814_v19  ;;  %1897 = vmatprep.subr.bf16.mxu1 %v2816_v20  ;;  %v439_v18 = vld [vmem:[%s3322_s30 + $0x5c8] sm:$0xff]  ;;  %v2817_v19 = vcombine.low %v390_v7, %v406_v8  ;;  %v2819_v20 = vcombine.low %v391_v9, %v407_v10  ;;  %v2822_v7 = vcombine.high %v392_v63, %v408_v1  ;;  %v424_v9 = vld [vmem:[%s3322_s30 + $0x550] sm:$0xff] }
  0xbe   : > { %v2852_v22 = vcombine.high %v423_v17, %v439_v18  ;;  %v440_v10 = vld [vmem:[%s3322_s30 + $0x5d0] sm:$0xff] }
  0xc0   : > { %1857 = vmatpush1.bf16.msra.mxu0 %v2813_v25  ;;  %1898 = vmatpush1.bf16.msra.mxu1 %v2815_v26  ;;  %v455_v25 = vld [vmem:[%s3322_s30 + $0x648] sm:$0xff] }
  0xc1   : > { %1858 = vmatprep.subr.bf16.mxu0 %v2846_v27  ;;  %1899 = vmatprep.subr.bf16.mxu1 %v2848_v28  ;;  %v471_v26 = vld [vmem:[%s3322_s30 + $0x6c8] sm:$0xff]  ;;  %v2849_v27 = vcombine.low %v422_v15, %v438_v16  ;;  %v2851_v28 = vcombine.low %v423_v17, %v439_v18  ;;  %v2854_v15 = vcombine.high %v424_v9, %v440_v10  ;;  %v456_v17 = vld [vmem:[%s3322_s30 + $0x650] sm:$0xff] }
  0xc2   : > { %v2884_v30 = vcombine.high %v455_v25, %v471_v26  ;;  %v472_v18 = vld [vmem:[%s3322_s30 + $0x6d0] sm:$0xff] }
  0xc4   : > { %1859 = vmatpush1.bf16.msra.mxu0 %v2845_v33  ;;  %1900 = vmatpush1.bf16.msra.mxu1 %v2847_v34  ;;  %v265_v33 = vld [vmem:[%s3322_s30 + $0x58] sm:$0xff] }
  0xc5   : > { %1860 = vmatprep.subr.bf16.mxu0 %v2878_v35  ;;  %1901 = vmatprep.subr.bf16.mxu1 %v2880_v36  ;;  %v281_v34 = vld [vmem:[%s3322_s30 + $0xd8] sm:$0xff]  ;;  %v2881_v35 = vcombine.low %v454_v23, %v470_v24  ;;  %v2883_v36 = vcombine.low %v455_v25, %v471_v26  ;;  %v2886_v23 = vcombine.high %v456_v17, %v472_v18  ;;  %v266_v25 = vld [vmem:[%s3322_s30 + $0x60] sm:$0xff] }
  0xc6   : > { %v2696_v38 = vcombine.high %v265_v33, %v281_v34  ;;  %v282_v26 = vld [vmem:[%s3322_s30 + $0xe0] sm:$0xff] }
  0xc8   : > { %1861 = vmatpush1.bf16.msra.mxu0 %v2877_v41  ;;  %1902 = vmatpush1.bf16.msra.mxu1 %v2879_v42  ;;  %v297_v41 = vld [vmem:[%s3322_s30 + $0x158] sm:$0xff] }
  0xc9   : > { %1930 = vmatprep.subr.bf16.mxu0 %v2690_v43  ;;  %1971 = vmatprep.subr.bf16.mxu1 %v2692_v44  ;;  %v313_v42 = vld [vmem:[%s3322_s30 + $0x1d8] sm:$0xff]  ;;  %v2693_v43 = vcombine.low %v264_v31, %v280_v32  ;;  %v2695_v44 = vcombine.low %v265_v33, %v281_v34  ;;  %v2698_v31 = vcombine.high %v266_v25, %v282_v26  ;;  %v298_v33 = vld [vmem:[%s3322_s30 + $0x160] sm:$0xff] }
  0xca   : > { %v2728_v46 = vcombine.high %v297_v41, %v313_v42  ;;  %v314_v34 = vld [vmem:[%s3322_s30 + $0x1e0] sm:$0xff] }
  0xcb   : > { %2903 = vmatmul.mubr.msk.bf16.vlgmr.msra.gmra.mrb[12].mxu0 %vm1598_vm0, %v3366_v4  ;;  %2904 = vmatmul.mubr.msk.bf16.vlgmr.msra.gmra.mrb[12].mxu1 %vm1598_vm0, %v3366_v4 }
  0xcc   : > { %1931 = vmatpush1.bf16.msra.mxu0 %v2689_v49  ;;  %1972 = vmatpush1.bf16.msra.mxu1 %v2691_v50  ;;  %v329_v49 = vld [vmem:[%s3322_s30 + $0x258] sm:$0xff] }
  0xcd   : > { %1932 = vmatprep.subr.bf16.mxu0 %v2722_v51  ;;  %1973 = vmatprep.subr.bf16.mxu1 %v2724_v52  ;;  %v345_v50 = vld [vmem:[%s3322_s30 + $0x2d8] sm:$0xff]  ;;  %v2725_v51 = vcombine.low %v296_v39, %v312_v40  ;;  %v2727_v52 = vcombine.low %v297_v41, %v313_v42  ;;  %v2730_v39 = vcombine.high %v298_v33, %v314_v34  ;;  %v330_v41 = vld [vmem:[%s3322_s30 + $0x260] sm:$0xff] }
  0xce   : > { %1962 = vmatprep.mubr.bf16.mxu0 %v3151_v0  ;;  %2003 = vmatprep.mubr.bf16.mxu1 %v3151_v0  ;;  %v2760_v54 = vcombine.high %v329_v49, %v345_v50  ;;  %v346_v42 = vld [vmem:[%s3322_s30 + $0x2e0] sm:$0xff] }
  0xd0   : > { %1933 = vmatpush1.bf16.msra.mxu0 %v2721_v57  ;;  %1974 = vmatpush1.bf16.msra.mxu1 %v2723_v58  ;;  %v361_v57 = vld [vmem:[%s3322_s30 + $0x358] sm:$0xff] }
  0xd1   : > { %1934 = vmatprep.subr.bf16.mxu0 %v2754_v59  ;;  %1975 = vmatprep.subr.bf16.mxu1 %v2756_v60  ;;  %v377_v58 = vld [vmem:[%s3322_s30 + $0x3d8] sm:$0xff]  ;;  %v2757_v59 = vcombine.low %v328_v47, %v344_v48  ;;  %v2759_v60 = vcombine.low %v329_v49, %v345_v50  ;;  %v2762_v47 = vcombine.high %v330_v41, %v346_v42  ;;  %v362_v49 = vld [vmem:[%s3322_s30 + $0x360] sm:$0xff] }
  0xd2   : > { %v2792_v62 = vcombine.high %v361_v57, %v377_v58  ;;  %v378_v50 = vld [vmem:[%s3322_s30 + $0x3e0] sm:$0xff] }
  0xd4   : > { %1935 = vmatpush1.bf16.msra.mxu0 %v2753_v2  ;;  %1976 = vmatpush1.bf16.msra.mxu1 %v2755_v3  ;;  %v393_v2 = vld [vmem:[%s3322_s30 + $0x458] sm:$0xff] }
  0xd5   : > { %1936 = vmatprep.subr.bf16.mxu0 %v2786_v5  ;;  %1977 = vmatprep.subr.bf16.mxu1 %v2788_v6  ;;  %v409_v3 = vld [vmem:[%s3322_s30 + $0x4d8] sm:$0xff]  ;;  %v2789_v5 = vcombine.low %v360_v55, %v376_v56  ;;  %v2791_v6 = vcombine.low %v361_v57, %v377_v58  ;;  %v394_v56 = vld [vmem:[%s3322_s30 + $0x460] sm:$0xff]  ;;  %v395_v58 = vld [vmem:[%s3322_s30 + $0x468] sm:$0xff] }
  0xd6   : > { %v2824_v8 = vcombine.high %v393_v2, %v409_v3  ;;  %v410_v57 = vld [vmem:[%s3322_s30 + $0x4e0] sm:$0xff] }
  0xd8   : > { %1937 = vmatpush1.bf16.msra.mxu0 %v2785_v11  ;;  %1978 = vmatpush1.bf16.msra.mxu1 %v2787_v12  ;;  %v425_v11 = vld [vmem:[%s3322_s30 + $0x558] sm:$0xff] }
  0xd9   : > { %1938 = vmatprep.subr.bf16.mxu0 %v2818_v13  ;;  %1979 = vmatprep.subr.bf16.mxu1 %v2820_v14  ;;  %v441_v12 = vld [vmem:[%s3322_s30 + $0x5d8] sm:$0xff]  ;;  %v2821_v13 = vcombine.low %v392_v63, %v408_v1  ;;  %v2823_v14 = vcombine.low %v393_v2, %v409_v3  ;;  %v426_v1 = vld [vmem:[%s3322_s30 + $0x560] sm:$0xff]  ;;  %v427_v3 = vld [vmem:[%s3322_s30 + $0x568] sm:$0xff] }
  0xda   : > { %v2856_v16 = vcombine.high %v425_v11, %v441_v12  ;;  %v442_v2 = vld [vmem:[%s3322_s30 + $0x5e0] sm:$0xff] }
  0xdc   : > { %1939 = vmatpush1.bf16.msra.mxu0 %v2817_v19  ;;  %1980 = vmatpush1.bf16.msra.mxu1 %v2819_v20  ;;  %v457_v19 = vld [vmem:[%s3322_s30 + $0x658] sm:$0xff] }
  0xdd   : > { %1940 = vmatprep.subr.bf16.mxu0 %v2850_v21  ;;  %1981 = vmatprep.subr.bf16.mxu1 %v2852_v22  ;;  %v473_v20 = vld [vmem:[%s3322_s30 + $0x6d8] sm:$0xff]  ;;  %v2853_v21 = vcombine.low %v424_v9, %v440_v10  ;;  %v2855_v22 = vcombine.low %v425_v11, %v441_v12  ;;  %v458_v10 = vld [vmem:[%s3322_s30 + $0x660] sm:$0xff]  ;;  %v459_v12 = vld [vmem:[%s3322_s30 + $0x668] sm:$0xff] }
  0xde   : > { %v2888_v24 = vcombine.high %v457_v19, %v473_v20  ;;  %v474_v11 = vld [vmem:[%s3322_s30 + $0x6e0] sm:$0xff] }
  0xe0   : > { %1941 = vmatpush1.bf16.msra.mxu0 %v2849_v27  ;;  %1982 = vmatpush1.bf16.msra.mxu1 %v2851_v28  ;;  %v267_v27 = vld [vmem:[%s3322_s30 + $0x68] sm:$0xff] }
  0xe1   : > { %1942 = vmatprep.subr.bf16.mxu0 %v2882_v29  ;;  %1983 = vmatprep.subr.bf16.mxu1 %v2884_v30  ;;  %v283_v28 = vld [vmem:[%s3322_s30 + $0xe8] sm:$0xff]  ;;  %v2885_v29 = vcombine.low %v456_v17, %v472_v18  ;;  %v2887_v30 = vcombine.low %v457_v19, %v473_v20  ;;  %v268_v18 = vld [vmem:[%s3322_s30 + $0x70] sm:$0xff]  ;;  %v269_v20 = vld [vmem:[%s3322_s30 + $0x78] sm:$0xff] }
  0xe2   : > { %v2700_v32 = vcombine.high %v267_v27, %v283_v28  ;;  %v284_v19 = vld [vmem:[%s3322_s30 + $0xf0] sm:$0xff] }
  0xe4   : > { %1943 = vmatpush1.bf16.msra.mxu0 %v2881_v35  ;;  %1984 = vmatpush1.bf16.msra.mxu1 %v2883_v36  ;;  %v299_v35 = vld [vmem:[%s3322_s30 + $0x168] sm:$0xff] }
  0xe5   : > { %2012 = vmatprep.subr.bf16.mxu0 %v2694_v37  ;;  %2053 = vmatprep.subr.bf16.mxu1 %v2696_v38  ;;  %v315_v36 = vld [vmem:[%s3322_s30 + $0x1e8] sm:$0xff]  ;;  %v2697_v37 = vcombine.low %v266_v25, %v282_v26  ;;  %v2699_v38 = vcombine.low %v267_v27, %v283_v28  ;;  %v300_v26 = vld [vmem:[%s3322_s30 + $0x170] sm:$0xff]  ;;  %v301_v28 = vld [vmem:[%s3322_s30 + $0x178] sm:$0xff] }
  0xe6   : > { %v2732_v40 = vcombine.high %v299_v35, %v315_v36  ;;  %v316_v27 = vld [vmem:[%s3322_s30 + $0x1f0] sm:$0xff] }
  0xe7   : > { %2905 = vmatmul.mubr.msk.bf16.vlgmr.msra.gmra.mrb[16].mxu0 %vm1598_vm0, %v3366_v4  ;;  %2906 = vmatmul.mubr.msk.bf16.vlgmr.msra.gmra.mrb[16].mxu1 %vm1598_vm0, %v3366_v4 }
  0xe8   : > { %2013 = vmatpush1.bf16.msra.mxu0 %v2693_v43  ;;  %2054 = vmatpush1.bf16.msra.mxu1 %v2695_v44  ;;  %v331_v43 = vld [vmem:[%s3322_s30 + $0x268] sm:$0xff] }
  0xe9   : > { %2014 = vmatprep.subr.bf16.mxu0 %v2726_v45  ;;  %2055 = vmatprep.subr.bf16.mxu1 %v2728_v46  ;;  %v347_v44 = vld [vmem:[%s3322_s30 + $0x2e8] sm:$0xff]  ;;  %v2729_v45 = vcombine.low %v298_v33, %v314_v34  ;;  %v2731_v46 = vcombine.low %v299_v35, %v315_v36  ;;  %v332_v34 = vld [vmem:[%s3322_s30 + $0x270] sm:$0xff]  ;;  %v3574_v36 = vld [vmem:[#allocation2] sm:$0xf] }
  0xea   : > { %2044 = vmatprep.mubr.bf16.mxu0 %v3151_v0  ;;  %2085 = vmatprep.mubr.bf16.mxu1 %v3151_v0  ;;  %v2764_v48 = vcombine.high %v331_v43, %v347_v44  ;;  %v348_v35 = vld [vmem:[%s3322_s30 + $0x2f0] sm:$0xff] }
  0xec   : > { %2015 = vmatpush1.bf16.msra.mxu0 %v2725_v51  ;;  %2056 = vmatpush1.bf16.msra.mxu1 %v2727_v52  ;;  %v363_v51 = vld [vmem:[%s3322_s30 + $0x368] sm:$0xff] }
  0xed   : > { %2016 = vmatprep.subr.bf16.mxu0 %v2758_v53  ;;  %2057 = vmatprep.subr.bf16.mxu1 %v2760_v54  ;;  %v379_v52 = vld [vmem:[%s3322_s30 + $0x3e8] sm:$0xff]  ;;  %v2763_v53 = vcombine.low %v331_v43, %v347_v44  ;;  %v2794_v54 = vcombine.high %v362_v49, %v378_v50  ;;  %v364_v43 = vld [vmem:[%s3322_s30 + $0x370] sm:$0xff] }
  0xee   : > { %v2796_v55 = vcombine.high %v363_v51, %v379_v52  ;;  %v380_v44 = vld [vmem:[%s3322_s30 + $0x3f0] sm:$0xff] }
  0xf0   : > { %2017 = vmatpush1.bf16.msra.mxu0 %v2757_v59  ;;  %2058 = vmatpush1.bf16.msra.mxu1 %v2759_v60  ;;  %v411_v59 = vld [vmem:[%s3322_s30 + $0x4e8] sm:$0xff]  ;;  %v2793_v60 = vcombine.low %v362_v49, %v378_v50  ;;  %v2798_v49 = vcombine.high %v364_v43, %v380_v44 }
  0xf1   : > { %2018 = vmatprep.subr.bf16.mxu0 %v2790_v61  ;;  %2059 = vmatprep.subr.bf16.mxu1 %v2792_v62  ;;  %v2795_v61 = vcombine.low %v363_v51, %v379_v52  ;;  %v2826_v62 = vcombine.high %v394_v56, %v410_v57  ;;  %v2828_v63 = vcombine.high %v395_v58, %v411_v59  ;;  %v396_v51 = vld [vmem:[%s3322_s30 + $0x470] sm:$0xff] }
  0xf2   : > { %v412_v52 = vld [vmem:[%s3322_s30 + $0x4f0] sm:$0xff] }
  0xf4   : > { %2019 = vmatpush1.bf16.msra.mxu0 %v2789_v5  ;;  %2060 = vmatpush1.bf16.msra.mxu1 %v2791_v6  ;;  %v443_v5 = vld [vmem:[%s3322_s30 + $0x5e8] sm:$0xff]  ;;  %v2825_v6 = vcombine.low %v394_v56, %v410_v57  ;;  %v428_v57 = vld [vmem:[%s3322_s30 + $0x570] sm:$0xff] }
  0xf5   : > { %2020 = vmatprep.subr.bf16.mxu0 %v2822_v7  ;;  %2061 = vmatprep.subr.bf16.mxu1 %v2824_v8  ;;  %v2827_v7 = vcombine.low %v395_v58, %v411_v59  ;;  %v2858_v8 = vcombine.high %v426_v1, %v442_v2  ;;  %v2860_v9 = vcombine.high %v427_v3, %v443_v5  ;;  %v444_v58 = vld [vmem:[%s3322_s30 + $0x5f0] sm:$0xff]  ;;  %v429_v59 = vld [vmem:[%s3322_s30 + $0x578] sm:$0xff] }
  0xf8   : > { %2021 = vmatpush1.bf16.msra.mxu0 %v2821_v13  ;;  %2062 = vmatpush1.bf16.msra.mxu1 %v2823_v14  ;;  %v475_v13 = vld [vmem:[%s3322_s30 + $0x6e8] sm:$0xff]  ;;  %v2857_v14 = vcombine.low %v426_v1, %v442_v2  ;;  %v460_v2 = vld [vmem:[%s3322_s30 + $0x670] sm:$0xff] }
  0xf9   : > { %2022 = vmatprep.subr.bf16.mxu0 %v2854_v15  ;;  %2063 = vmatprep.subr.bf16.mxu1 %v2856_v16  ;;  %v2859_v15 = vcombine.low %v427_v3, %v443_v5  ;;  %v2890_v16 = vcombine.high %v458_v10, %v474_v11  ;;  %v2892_v17 = vcombine.high %v459_v12, %v475_v13  ;;  %v476_v3 = vld [vmem:[%s3322_s30 + $0x6f0] sm:$0xff]  ;;  %v461_v5 = vld [vmem:[%s3322_s30 + $0x678] sm:$0xff] }
  0xfc   : > { %2023 = vmatpush1.bf16.msra.mxu0 %v2853_v21  ;;  %2064 = vmatpush1.bf16.msra.mxu1 %v2855_v22  ;;  %v285_v21 = vld [vmem:[%s3322_s30 + $0xf8] sm:$0xff]  ;;  %v2889_v22 = vcombine.low %v458_v10, %v474_v11  ;;  %v2893_v11 = vcombine.low %v460_v2, %v476_v3 }
  0xfd   : > { %2024 = vmatprep.subr.bf16.mxu0 %v2886_v23  ;;  %2065 = vmatprep.subr.bf16.mxu1 %v2888_v24  ;;  %v2891_v23 = vcombine.low %v459_v12, %v475_v13  ;;  %v2702_v24 = vcombine.high %v268_v18, %v284_v19  ;;  %v2704_v25 = vcombine.high %v269_v20, %v285_v21 }
 0x100   : > { %2025 = vmatpush1.bf16.msra.mxu0 %v2885_v29  ;;  %2066 = vmatpush1.bf16.msra.mxu1 %v2887_v30  ;;  %v317_v29 = vld [vmem:[%s3322_s30 + $0x1f8] sm:$0xff]  ;;  %v2701_v30 = vcombine.low %v268_v18, %v284_v19 }
 0x101   : > { %2094 = vmatprep.subr.bf16.mxu0 %v2698_v31  ;;  %2135 = vmatprep.subr.bf16.mxu1 %v2700_v32  ;;  %v2703_v31 = vcombine.low %v269_v20, %v285_v21  ;;  %v2734_v32 = vcombine.high %v300_v26, %v316_v27  ;;  %v2736_v33 = vcombine.high %v301_v28, %v317_v29 }
 0x103   : > { %2907 = vmatmul.mubr.msk.bf16.vlgmr.msra.gmra.mrb[20].mxu0 %vm1598_vm0, %v3366_v4  ;;  %2908 = vmatmul.mubr.msk.bf16.vlgmr.msra.gmra.mrb[20].mxu1 %vm1598_vm0, %v3366_v4  ;;  %v2761_v4 = vcombine.low %v330_v41, %v346_v42  ;;  %v2766_v41 = vcombine.high %v332_v34, %v348_v35 }
 0x104   : > { %2095 = vmatpush1.bf16.msra.mxu0 %v2697_v37  ;;  %2136 = vmatpush1.bf16.msra.mxu1 %v2699_v38  ;;  %v333_v37 = vld [vmem:[%s3322_s30 + $0x278] sm:$0xff] }
 0x105   : > { %2096 = vmatprep.subr.bf16.mxu0 %v2730_v39  ;;  %2137 = vmatprep.subr.bf16.mxu1 %v2732_v40  ;;  %v349_v38 = vld [vmem:[%s3322_s30 + $0x2f8] sm:$0xff]  ;;  %v2733_v39 = vcombine.low %v300_v26, %v316_v27  ;;  %v2735_v40 = vcombine.low %v301_v28, %v317_v29 }
 0x106   : > { %2126 = vmatprep.mubr.bf16.mxu0 %v3151_v0  ;;  %2167 = vmatprep.mubr.bf16.mxu1 %v3151_v0  ;;  %v2768_v42 = vcombine.high %v333_v37, %v349_v38 }
 0x108   : > { %2097 = vmatpush1.bf16.msra.mxu0 %v2729_v45  ;;  %2138 = vmatpush1.bf16.msra.mxu1 %v2731_v46  ;;  %v365_v45 = vld [vmem:[%s3322_s30 + $0x378] sm:$0xff] }
 0x109   : > { %2098 = vmatprep.subr.bf16.mxu0 %v2762_v47  ;;  %2139 = vmatprep.subr.bf16.mxu1 %v2764_v48  ;;  %v381_v46 = vld [vmem:[%s3322_s30 + $0x3f8] sm:$0xff]  ;;  %v2765_v47 = vcombine.low %v332_v34, %v348_v35  ;;  %v2767_v48 = vcombine.low %v333_v37, %v349_v38 }
 0x10a   : > { %v2800_v50 = vcombine.high %v365_v45, %v381_v46 }
 0x10c   : > { %2099 = vmatpush1.bf16.msra.mxu0 %v2761_v4  ;;  %2140 = vmatpush1.bf16.msra.mxu1 %v2763_v53  ;;  %v397_v4 = vld [vmem:[%s3322_s30 + $0x478] sm:$0xff] }
 0x10d   : > { %2100 = vmatprep.subr.bf16.mxu0 %v2794_v54  ;;  %2141 = vmatprep.subr.bf16.mxu1 %v2796_v55  ;;  %v413_v53 = vld [vmem:[%s3322_s30 + $0x4f8] sm:$0xff]  ;;  %v2797_v54 = vcombine.low %v364_v43, %v380_v44  ;;  %v2830_v55 = vcombine.high %v396_v51, %v412_v52 }
 0x10e   : > { %v2832_v56 = vcombine.high %v397_v4, %v413_v53 }
 0x110   : > { %2101 = vmatpush1.bf16.msra.mxu0 %v2793_v60  ;;  %2142 = vmatpush1.bf16.msra.mxu1 %v2795_v61  ;;  %v445_v60 = vld [vmem:[%s3322_s30 + $0x5f8] sm:$0xff]  ;;  %v2829_v61 = vcombine.low %v396_v51, %v412_v52 }
 0x111   : > { %2102 = vmatprep.subr.bf16.mxu0 %v2826_v62  ;;  %2143 = vmatprep.subr.bf16.mxu1 %v2828_v63  ;;  %v2831_v62 = vcombine.low %v397_v4, %v413_v53  ;;  %v2862_v63 = vcombine.high %v428_v57, %v444_v58  ;;  %v2864_v1 = vcombine.high %v429_v59, %v445_v60 }
 0x114   : > { %2103 = vmatpush1.bf16.msra.mxu0 %v2825_v6  ;;  %2144 = vmatpush1.bf16.msra.mxu1 %v2827_v7  ;;  %v477_v6 = vld [vmem:[%s3322_s30 + $0x6f8] sm:$0xff]  ;;  %v2861_v7 = vcombine.low %v428_v57, %v444_v58 }
 0x115   : > { %2104 = vmatprep.subr.bf16.mxu0 %v2858_v8  ;;  %2145 = vmatprep.subr.bf16.mxu1 %v2860_v9  ;;  %v2863_v8 = vcombine.low %v429_v59, %v445_v60  ;;  %v2894_v9 = vcombine.high %v460_v2, %v476_v3  ;;  %v2896_v10 = vcombine.high %v461_v5, %v477_v6 }
 0x116   : > { %v2895_v12 = vcombine.low %v461_v5, %v477_v6 }
 0x118   : > { %2105 = vmatpush1.bf16.msra.mxu0 %v2857_v14  ;;  %2146 = vmatpush1.bf16.msra.mxu1 %v2859_v15 }
 0x119   : > { %2106 = vmatprep.subr.bf16.mxu0 %v2890_v16  ;;  %2147 = vmatprep.subr.bf16.mxu1 %v2892_v17 }
 0x11c   : > { %2107 = vmatpush1.bf16.msra.mxu0 %v2889_v22  ;;  %2148 = vmatpush1.bf16.msra.mxu1 %v2891_v23 }
 0x11d   : > { %2176 = vmatprep.subr.bf16.mxu0 %v2702_v24  ;;  %2217 = vmatprep.subr.bf16.mxu1 %v2704_v25 }
 0x11f   : > { %2909 = vmatmul.mubr.msk.bf16.vlgmr.msra.gmra.mrb[24].mxu0 %vm1598_vm0, %v3574_v36  ;;  %2910 = vmatmul.mubr.msk.bf16.vlgmr.msra.gmra.mrb[24].mxu1 %vm1598_vm0, %v3574_v36 }
 0x120   : > { %2177 = vmatpush1.bf16.msra.mxu0 %v2701_v30  ;;  %2218 = vmatpush1.bf16.msra.mxu1 %v2703_v31 }
 0x121   : > { %2178 = vmatprep.subr.bf16.mxu0 %v2734_v32  ;;  %2219 = vmatprep.subr.bf16.mxu1 %v2736_v33 }
 0x122   : > { %2208 = vmatprep.mubr.bf16.mxu0 %v3151_v0  ;;  %2249 = vmatprep.mubr.bf16.mxu1 %v3151_v0  ;;  %v2799_v0 = vcombine.low %v365_v45, %v381_v46 }
 0x124   : > { %2179 = vmatpush1.bf16.msra.mxu0 %v2733_v39  ;;  %2220 = vmatpush1.bf16.msra.mxu1 %v2735_v40 }
 0x125   : > { %2180 = vmatprep.subr.bf16.mxu0 %v2766_v41  ;;  %2221 = vmatprep.subr.bf16.mxu1 %v2768_v42 }
 0x128   : > { %2181 = vmatpush1.bf16.msra.mxu0 %v2765_v47  ;;  %2222 = vmatpush1.bf16.msra.mxu1 %v2767_v48 }
 0x129   : > { %2182 = vmatprep.subr.bf16.mxu0 %v2798_v49  ;;  %2223 = vmatprep.subr.bf16.mxu1 %v2800_v50 }
 0x12c   : > { %2183 = vmatpush1.bf16.msra.mxu0 %v2797_v54  ;;  %2224 = vmatpush1.bf16.msra.mxu1 %v2799_v0 }
 0x12d   : > { %2184 = vmatprep.subr.bf16.mxu0 %v2830_v55  ;;  %2225 = vmatprep.subr.bf16.mxu1 %v2832_v56 }
 0x130   : > { %2185 = vmatpush1.bf16.msra.mxu0 %v2829_v61  ;;  %2226 = vmatpush1.bf16.msra.mxu1 %v2831_v62 }
 0x131   : > { %2186 = vmatprep.subr.bf16.mxu0 %v2862_v63  ;;  %2227 = vmatprep.subr.bf16.mxu1 %v2864_v1 }
 0x134   : > { %2187 = vmatpush1.bf16.msra.mxu0 %v2861_v7  ;;  %2228 = vmatpush1.bf16.msra.mxu1 %v2863_v8 }
 0x135   : > { %2188 = vmatprep.subr.bf16.mxu0 %v2894_v9  ;;  %2229 = vmatprep.subr.bf16.mxu1 %v2896_v10 }
 0x138   : > { %2189 = vmatpush1.bf16.msra.mxu0 %v2893_v11  ;;  %2230 = vmatpush1.bf16.msra.mxu1 %v2895_v12 }
 0x13b   : > { %2911 = vmatmul.mubr.msk.bf16.vlgmr.msra.gmra.mrb[28].mxu0 %vm1598_vm0, %v3574_v36  ;;  %2912 = vmatmul.mubr.msk.bf16.vlgmr.msra.gmra.mrb[28].mxu1 %vm1598_vm0, %v3574_v36 }
 0x14a   : > { %v1636_v13 = vpop.f32.mrb[0].mxu0  ;;  %v1677_v16 = vpop.f32.mrb[0].mxu1 }
 0x14b   : > { %v2437_v14 = vmul.f32 %v1636_v13, %v1636_v13  ;;  %v1638_v15 = vpop.f32.mrb[1].mxu0  ;;  %v2439_v21 = vmul.f32 %v1677_v16, %v1677_v16  ;;  %v1679_v22 = vpop.f32.mrb[1].mxu1 }
 0x14c   : > { %v2935_v17 = vpack.c.bf16 %v1638_v15, %v1636_v13  ;;  %v2402_v18 = vadd.f32 %v1638_v15, %v1636_v13  ;;  %v2438_v19 = vmul.f32 %v1638_v15, %v1638_v15  ;;  %v1640_v20 = vpop.f32.mrb[2].mxu0  ;;  %v2936_v24 = vpack.c.bf16 %v1679_v22, %v1677_v16  ;;  %v1681_v25 = vpop.f32.mrb[2].mxu1 }
 0x14d   : > { %v1641_v23 = vpop.f32.mrb[3].mxu0  ;;  %v2440_v28 = vmul.f32 %v1679_v22, %v1679_v22  ;;  %v1682_v29 = vpop.f32.mrb[3].mxu1 }
 0x14e   : > { %2386 = vst [vmem:[%s3605_s29] sm:$0xff] %v2935_v17  ;;  %v2469_v26 = vadd.f32 %v2438_v19, %v2437_v14  ;;  %v2403_v27 = vadd.f32 %v2402_v18, %v1677_v16  ;;  %2387 = vst [vmem:[%s3605_s29 + $0x8] sm:$0xff] %v2936_v24 }
 0x150   : > { %v2470_v30 = vadd.f32 %v2469_v26, %v2439_v21  ;;  %v2404_v31 = vadd.f32 %v2403_v27, %v1679_v22 }
 0x152   : > { %v2471_v32 = vadd.f32 %v2470_v30, %v2440_v28 }
 0x166   : > { %v1718_v33 = vpop.f32.mrb[4].mxu0  ;;  %v1759_v37 = vpop.f32.mrb[4].mxu1 }
 0x167   : > { %v2405_v34 = vadd.f32 %v2404_v31, %v1718_v33  ;;  %v2441_v35 = vmul.f32 %v1718_v33, %v1718_v33  ;;  %v1720_v36 = vpop.f32.mrb[5].mxu0  ;;  %v1761_v41 = vpop.f32.mrb[5].mxu1  ;;  %v2443_v44 = vmul.f32 %v1759_v37, %v1759_v37 }
 0x168   : > { %v2937_v38 = vpack.c.bf16 %v1720_v36, %v1718_v33  ;;  %v2442_v39 = vmul.f32 %v1720_v36, %v1720_v36  ;;  %v1722_v40 = vpop.f32.mrb[6].mxu0  ;;  %v2938_v46 = vpack.c.bf16 %v1761_v41, %v1759_v37  ;;  %v1763_v47 = vpop.f32.mrb[6].mxu1  ;;  %v2444_v51 = vmul.f32 %v1761_v41, %v1761_v41 }
 0x169   : > { %v2472_v42 = vadd.f32 %v2471_v32, %v2441_v35  ;;  %v2406_v43 = vadd.f32 %v2405_v34, %v1720_v36  ;;  %v1723_v45 = vpop.f32.mrb[7].mxu0  ;;  %v1764_v48 = vpop.f32.mrb[7].mxu1 }
 0x16a   : > { %2388 = vst [vmem:[%s3605_s29 + $0x10] sm:$0xff] %v2937_v38  ;;  %2389 = vst [vmem:[%s3605_s29 + $0x18] sm:$0xff] %v2938_v46 }
 0x16b   : > { %v2473_v49 = vadd.f32 %v2472_v42, %v2442_v39  ;;  %v2407_v50 = vadd.f32 %v2406_v43, %v1759_v37 }
 0x16d   : > { %v2474_v52 = vadd.f32 %v2473_v49, %v2443_v44  ;;  %v2408_v4 = vadd.f32 %v2407_v50, %v1761_v41 }
 0x16f   : > { %v2475_v53 = vadd.f32 %v2474_v52, %v2444_v51 }
 0x182   : > { %v1800_v54 = vpop.f32.mrb[8].mxu0  ;;  %v1841_v57 = vpop.f32.mrb[8].mxu1 }
 0x183   : > { %v2409_v0 = vadd.f32 %v2408_v4, %v1800_v54  ;;  %v2445_v55 = vmul.f32 %v1800_v54, %v1800_v54  ;;  %v1802_v56 = vpop.f32.mrb[9].mxu0  ;;  %v1843_v61 = vpop.f32.mrb[9].mxu1  ;;  %v2447_v1 = vmul.f32 %v1841_v57, %v1841_v57 }
 0x184   : > { %v2939_v58 = vpack.c.bf16 %v1802_v56, %v1800_v54  ;;  %v2446_v59 = vmul.f32 %v1802_v56, %v1802_v56  ;;  %v1804_v60 = vpop.f32.mrb[10].mxu0  ;;  %v2940_v3 = vpack.c.bf16 %v1843_v61, %v1841_v57  ;;  %v1845_v5 = vpop.f32.mrb[10].mxu1  ;;  %v2448_v9 = vmul.f32 %v1843_v61, %v1843_v61 }
 0x185   : > { %v2476_v62 = vadd.f32 %v2475_v53, %v2445_v55  ;;  %v2410_v63 = vadd.f32 %v2409_v0, %v1802_v56  ;;  %v1805_v2 = vpop.f32.mrb[11].mxu0  ;;  %v1846_v6 = vpop.f32.mrb[11].mxu1 }
 0x186   : > { %2390 = vst [vmem:[%s3605_s29 + $0x20] sm:$0xff] %v2939_v58  ;;  %2391 = vst [vmem:[%s3605_s29 + $0x28] sm:$0xff] %v2940_v3 }
 0x187   : > { %v2477_v7 = vadd.f32 %v2476_v62, %v2446_v59  ;;  %v2411_v8 = vadd.f32 %v2410_v63, %v1841_v57 }
 0x189   : > { %v2478_v10 = vadd.f32 %v2477_v7, %v2447_v1  ;;  %v2412_v11 = vadd.f32 %v2411_v8, %v1843_v61 }
 0x18b   : > { %v2479_v12 = vadd.f32 %v2478_v10, %v2448_v9 }
 0x19e   : > { %v1882_v13 = vpop.f32.mrb[12].mxu0  ;;  %v1923_v17 = vpop.f32.mrb[12].mxu1 }
 0x19f   : > { %v2413_v14 = vadd.f32 %v2412_v11, %v1882_v13  ;;  %v2449_v15 = vmul.f32 %v1882_v13, %v1882_v13  ;;  %v1884_v16 = vpop.f32.mrb[13].mxu0  ;;  %v1925_v21 = vpop.f32.mrb[13].mxu1  ;;  %v2451_v24 = vmul.f32 %v1923_v17, %v1923_v17 }
 0x1a0   : > { %v2941_v18 = vpack.c.bf16 %v1884_v16, %v1882_v13  ;;  %v2450_v19 = vmul.f32 %v1884_v16, %v1884_v16  ;;  %v1886_v20 = vpop.f32.mrb[14].mxu0  ;;  %v2942_v26 = vpack.c.bf16 %v1925_v21, %v1923_v17  ;;  %v1927_v27 = vpop.f32.mrb[14].mxu1  ;;  %v2452_v31 = vmul.f32 %v1925_v21, %v1925_v21 }
 0x1a1   : > { %v2480_v22 = vadd.f32 %v2479_v12, %v2449_v15  ;;  %v2414_v23 = vadd.f32 %v2413_v14, %v1884_v16  ;;  %v1887_v25 = vpop.f32.mrb[15].mxu0  ;;  %v1928_v28 = vpop.f32.mrb[15].mxu1 }
 0x1a2   : > { %2392 = vst [vmem:[%s3605_s29 + $0x30] sm:$0xff] %v2941_v18  ;;  %2393 = vst [vmem:[%s3605_s29 + $0x38] sm:$0xff] %v2942_v26 }
 0x1a3   : > { %v2481_v29 = vadd.f32 %v2480_v22, %v2450_v19  ;;  %v2415_v30 = vadd.f32 %v2414_v23, %v1923_v17 }
 0x1a5   : > { %v2482_v32 = vadd.f32 %v2481_v29, %v2451_v24  ;;  %v2416_v33 = vadd.f32 %v2415_v30, %v1925_v21 }
 0x1a7   : > { %v2483_v34 = vadd.f32 %v2482_v32, %v2452_v31 }
 0x1ba   : > { %v1964_v35 = vpop.f32.mrb[16].mxu0  ;;  %v2005_v39 = vpop.f32.mrb[16].mxu1 }
 0x1bb   : > { %v2417_v36 = vadd.f32 %v2416_v33, %v1964_v35  ;;  %v2453_v37 = vmul.f32 %v1964_v35, %v1964_v35  ;;  %v1966_v38 = vpop.f32.mrb[17].mxu0  ;;  %v2007_v43 = vpop.f32.mrb[17].mxu1  ;;  %v2455_v46 = vmul.f32 %v2005_v39, %v2005_v39 }
 0x1bc   : > { %v2943_v40 = vpack.c.bf16 %v1966_v38, %v1964_v35  ;;  %v2454_v41 = vmul.f32 %v1966_v38, %v1966_v38  ;;  %v1968_v42 = vpop.f32.mrb[18].mxu0  ;;  %v2944_v48 = vpack.c.bf16 %v2007_v43, %v2005_v39  ;;  %v2009_v49 = vpop.f32.mrb[18].mxu1  ;;  %v2456_v4 = vmul.f32 %v2007_v43, %v2007_v43 }
 0x1bd   : > { %v2484_v44 = vadd.f32 %v2483_v34, %v2453_v37  ;;  %v2418_v45 = vadd.f32 %v2417_v36, %v1966_v38  ;;  %v1969_v47 = vpop.f32.mrb[19].mxu0  ;;  %v2010_v50 = vpop.f32.mrb[19].mxu1 }
 0x1be   : > { %2394 = vst [vmem:[%s3605_s29 + $0x40] sm:$0xff] %v2943_v40  ;;  %2395 = vst [vmem:[%s3605_s29 + $0x48] sm:$0xff] %v2944_v48 }
 0x1bf   : > { %v2485_v51 = vadd.f32 %v2484_v44, %v2454_v41  ;;  %v2419_v52 = vadd.f32 %v2418_v45, %v2005_v39 }
 0x1c1   : > { %v2486_v53 = vadd.f32 %v2485_v51, %v2455_v46  ;;  %v2420_v54 = vadd.f32 %v2419_v52, %v2007_v43 }
 0x1c3   : > { %v2487_v0 = vadd.f32 %v2486_v53, %v2456_v4 }
 0x1d6   : > { %v2046_v55 = vpop.f32.mrb[20].mxu0  ;;  %v2087_v59 = vpop.f32.mrb[20].mxu1 }
 0x1d7   : > { %v2421_v56 = vadd.f32 %v2420_v54, %v2046_v55  ;;  %v2457_v57 = vmul.f32 %v2046_v55, %v2046_v55  ;;  %v2048_v58 = vpop.f32.mrb[21].mxu0  ;;  %v2089_v63 = vpop.f32.mrb[21].mxu1  ;;  %v2459_v3 = vmul.f32 %v2087_v59, %v2087_v59 }
 0x1d8   : > { %v2945_v60 = vpack.c.bf16 %v2048_v58, %v2046_v55  ;;  %v2458_v61 = vmul.f32 %v2048_v58, %v2048_v58  ;;  %v2050_v62 = vpop.f32.mrb[22].mxu0  ;;  %v2946_v6 = vpack.c.bf16 %v2089_v63, %v2087_v59  ;;  %v2091_v7 = vpop.f32.mrb[22].mxu1  ;;  %v2460_v11 = vmul.f32 %v2089_v63, %v2089_v63 }
 0x1d9   : > { %v2488_v1 = vadd.f32 %v2487_v0, %v2457_v57  ;;  %v2422_v2 = vadd.f32 %v2421_v56, %v2048_v58  ;;  %v2051_v5 = vpop.f32.mrb[23].mxu0  ;;  %v2092_v8 = vpop.f32.mrb[23].mxu1 }
 0x1da   : > { %2396 = vst [vmem:[%s3605_s29 + $0x50] sm:$0xff] %v2945_v60  ;;  %2397 = vst [vmem:[%s3605_s29 + $0x58] sm:$0xff] %v2946_v6 }
 0x1db   : > { %v2489_v9 = vadd.f32 %v2488_v1, %v2458_v61  ;;  %v2423_v10 = vadd.f32 %v2422_v2, %v2087_v59 }
 0x1dd   : > { %v2490_v12 = vadd.f32 %v2489_v9, %v2459_v3  ;;  %v2424_v13 = vadd.f32 %v2423_v10, %v2089_v63 }
 0x1df   : > { %v2491_v14 = vadd.f32 %v2490_v12, %v2460_v11 }
 0x1f2   : > { %v2128_v15 = vpop.f32.mrb[24].mxu0  ;;  %v2169_v19 = vpop.f32.mrb[24].mxu1 }
 0x1f3   : > { %v2425_v16 = vadd.f32 %v2424_v13, %v2128_v15  ;;  %v2461_v17 = vmul.f32 %v2128_v15, %v2128_v15  ;;  %v2130_v18 = vpop.f32.mrb[25].mxu0  ;;  %v2171_v23 = vpop.f32.mrb[25].mxu1  ;;  %v2463_v26 = vmul.f32 %v2169_v19, %v2169_v19 }
 0x1f4   : > { %v2947_v20 = vpack.c.bf16 %v2130_v18, %v2128_v15  ;;  %v2462_v21 = vmul.f32 %v2130_v18, %v2130_v18  ;;  %v2132_v22 = vpop.f32.mrb[26].mxu0  ;;  %v2948_v28 = vpack.c.bf16 %v2171_v23, %v2169_v19  ;;  %v2173_v29 = vpop.f32.mrb[26].mxu1  ;;  %v2464_v33 = vmul.f32 %v2171_v23, %v2171_v23 }
 0x1f5   : > { %v2492_v24 = vadd.f32 %v2491_v14, %v2461_v17  ;;  %v2426_v25 = vadd.f32 %v2425_v16, %v2130_v18  ;;  %v2133_v27 = vpop.f32.mrb[27].mxu0  ;;  %v2174_v30 = vpop.f32.mrb[27].mxu1 }
 0x1f6   : > { %2398 = vst [vmem:[%s3605_s29 + $0x60] sm:$0xff] %v2947_v20  ;;  %2399 = vst [vmem:[%s3605_s29 + $0x68] sm:$0xff] %v2948_v28 }
 0x1f7   : > { %v2493_v31 = vadd.f32 %v2492_v24, %v2462_v21  ;;  %v2427_v32 = vadd.f32 %v2426_v25, %v2169_v19 }
 0x1f9   : > { %v2494_v34 = vadd.f32 %v2493_v31, %v2463_v26  ;;  %v2428_v35 = vadd.f32 %v2427_v32, %v2171_v23 }
 0x1fb   : > { %v2495_v36 = vadd.f32 %v2494_v34, %v2464_v33 }
 0x20e   : > { %v2210_v37 = vpop.f32.mrb[28].mxu0  ;;  %v2251_v41 = vpop.f32.mrb[28].mxu1 }
 0x20f   : > { %v2429_v38 = vadd.f32 %v2428_v35, %v2210_v37  ;;  %v2465_v39 = vmul.f32 %v2210_v37, %v2210_v37  ;;  %v2212_v40 = vpop.f32.mrb[29].mxu0  ;;  %v2253_v45 = vpop.f32.mrb[29].mxu1  ;;  %v2467_v48 = vmul.f32 %v2251_v41, %v2251_v41 }
 0x210   : > { %v2949_v42 = vpack.c.bf16 %v2212_v40, %v2210_v37  ;;  %v2466_v43 = vmul.f32 %v2212_v40, %v2212_v40  ;;  %v2214_v44 = vpop.f32.mrb[30].mxu0  ;;  %v2950_v49 = vpack.c.bf16 %v2253_v45, %v2251_v41  ;;  %v2255_v51 = vpop.f32.mrb[30].mxu1  ;;  %v2468_v0 = vmul.f32 %v2253_v45, %v2253_v45 }
 0x211   : > { %v2496_v46 = vadd.f32 %v2495_v36, %v2465_v39  ;;  %v2430_v47 = vadd.f32 %v2429_v38, %v2212_v40  ;;  %v2215_v50 = vpop.f32.mrb[31].mxu0  ;;  %v2256_v52 = vpop.f32.mrb[31].mxu1 }
 0x212   : > { %2400 = vst [vmem:[%s3605_s29 + $0x70] sm:$0xff] %v2949_v42  ;;  %2401 = vst [vmem:[%s3605_s29 + $0x78] sm:$0xff] %v2950_v49 }
 0x213   : > { %v2431_v4 = vadd.f32 %v2430_v47, %v2251_v41  ;;  %v2497_v53 = vadd.f32 %v2496_v46, %v2466_v43 }
 0x215   : > { %v2432_v54 = vadd.f32 %v2431_v4, %v2253_v45  ;;  %v2498_v55 = vadd.f32 %v2497_v53, %v2467_v48 }
 0x217   : > { %2433 = vadd.xlane.f32.xlu0 %v2432_v54  ;;  %v2499_v56 = vadd.f32 %v2498_v55, %v2468_v0 }
 0x21b   : > { %2500 = vadd.xlane.f32.xlu0 %v2499_v56 }
 0x21c   : > { %3087 = shalt.err (!%p3084_p13)
}
 0x21d   : > { %s3088_s5 = scalar_lea.hbm %s3628_s7, 2048  ;;  %s3092_s25 = scalar_lea.hbm %s3676_s2, 4096 }
 0x21e   : > { %p3089_p7 = scmp.ne.s32.totalorder %s3628_s7, %s3088_s5  ;;  %p3093_p1 = scmp.lt.u32.totalorder %s3628_s7, %s3676_s2 }
 0x21f   : > { %p3094_p8 = scmp.lt.u32.totalorder %s3092_s25, %s3088_s5  ;;  %p3096_p9 = scmp.lt.u32.totalorder %s3088_s5, %s3628_s7 }
 0x220   : > { %p3090_p3 = pnand %p3089_p7, %p3697_p10 }
 0x221   : > { %p3095_p11 = por %p3094_p8, %p3093_p1 }
 0x222   : > { %p3091_p12 = pneg %p3090_p3 }
 0x223   : > { %p3097_p2 = por %p3096_p9, %p3095_p11 }
 0x225   : > { %p3098_p4 = pnand %p3097_p2, %p3091_p12 }
 0x227   : > { %3101 = shalt.err (!%p3098_p4)
}
 0x228   : > { %2960 = dma.vmem_to_hbm [thread:$0]  (%p3697_p10), %s2527_s12, 2048, %s3628_s7, %s2504_s10   ;;  %vm2435_vm1 = vcmask 7168  }
 0x229   : > { %p244_p5 = scmp.lt.s32.totalorder %s3199_s19, 1 }
 0x22b   : > { %s3705_s19 = smov (!%p244_p5, %s3199_s19), 1 }
 0x22c   : > { %s2671_s29 = sshll.u32 %s3705_s19, 3 }
 0x22d   : > { %s247_s6 = scalar_lea.vmem %s3677_s3, %s2671_s29  ;;  %s251_s14 = scalar_lea.vmem %s3678_s4, %s2671_s29 }
 0x2a4   : > { %v2434_v57 = vpop.xlane.xlu0 %2433 }
 0x2a5   : > { %2436 = vst.msk [vmem:[%s247_s6] sm:$0xff] %vm2435_vm1, %v2434_v57 }
 0x2a8   : > { %v2501_v58 = vpop.xlane.xlu0 %2500 }
 0x2a9   : > { %2502 = vst.msk [vmem:[%s251_s14] sm:$0xff] %vm2435_vm1, %v2501_v58 }
 0x2aa PF: > { %s2544_s27 = sand.u32 1, %s3132_s15   ;;  %p3698_p10 = scmp.ne.s32.totalorder %s3687_s28, 0 }
 0x2ab   : > { %p3699_p0 = scmp.ge.s32.totalorder %s3144_s18, 2  ;;  %s2545_s19 = scalar_lea.sflag [#allocation4], %s2544_s27 }
 0x2ad   : > { %p2971_p6 = pnand %p3699_p0, %p3698_p10 }
 0x2af   : > { %3127 = dma.done.wait (!%p2971_p6), %s2545_s19, 2048  }
 0x2b0   : > { %3129 = vsyncadd (!%p2971_p6), %s2545_s19, 4294965248  ;;  %p19_p13 = scmp.ge.s32.totalorder %s3203_s21, 4   ;;  %s3700_s15 = smov %s3136_s16 }
 0x2b1   : > { %s3701_s16 = smov %s3140_s17  ;;  %s3702_s17 = smov %s3215_s24 }
 0x2b2   : > { %s3703_s18 = smov %s3203_s21  ;;  %21 = sbr.rel (!%p19_p13) target bundleno = 6 (0x6), region = 102 }
 0x2b9   :  { %2564 = vsyncpa [#allocation3], 1 }
 0x2ba   :  { %2566 = vsyncpa [#allocation3 + $0x1], 1 }
 0x2bb   :  { %2567 = vsyncpa [#allocation6], 1 }
 0x2bc   :  { %2569 = vsyncpa [#allocation6 + $0x1], 1 }
 0x2bd   :  { %2570 = vsyncpa [#allocation4], 1 }
 0x2be   :  { %2572 = vsyncpa [#allocation4 + $0x1], 1 }

</bundles_post_ra>
